<compile_context>
chip_gen: v5e
topology: v5e:2x2
jax: 0.10.0
libtpu: 0.0.40
codegen_flags: <defaults>
</compile_context>

<pallas_src>
import functools

import jax
import jax.numpy as jnp
from jax.experimental import pallas as pl
from jax.experimental.pallas import tpu as pltpu


def _layer_norm(v, gamma, beta, eps=1e-5):
    # PyTorch nn.LayerNorm: biased variance over the last dim.
    mean = jnp.mean(v, axis=-1, keepdims=True)
    var = jnp.mean((v - mean) ** 2, axis=-1, keepdims=True)
    return (v - mean) * jax.lax.rsqrt(var + eps) * gamma + beta


def fused_encoder_kernel(*refs, batch, seq, num_heads, head_dim, has_mask):
    # refs = (inputs..., out_ref, act_scratch, attn_scratch)
    if has_mask:
        x_ref, mask_ref = refs[0], refs[1]
        w_refs = refs[2:14]
    else:
        x_ref, mask_ref = refs[0], None
        w_refs = refs[1:13]
    (wqkv_ref, bqkv_ref, wo_ref, bo_ref, g1_ref, be1_ref,
     w1_ref, b1_ref, w2_ref, b2_ref, g2_ref, be2_ref) = w_refs
    o_ref, act_ref, attn_ref = refs[-3], refs[-2], refs[-1]

    layer = pl.program_id(0)
    D = num_heads * head_dim
    scale = head_dim ** (-0.5)

    @pl.when(layer == 0)
    def _():
        act_ref[...] = x_ref[...].astype(jnp.float32)

    x = act_ref[...]                     # (B*N, D) f32, carried across layers

    def linear(v, w_ref, b_ref):
        # weight pre-transposed to (in, out) bf16; f32 MXU accumulation.
        return jnp.dot(v.astype(jnp.bfloat16), w_ref[0],
                       preferred_element_type=jnp.float32) + b_ref[0]

    # --- MultiHeadAttention (abs_pos_embed = Identity => q = k = x, v = x) --
    qkv = linear(x, wqkv_ref, bqkv_ref)                     # (B*N, 3D)
    q = (qkv[:, :D] * scale).reshape(batch, seq, D)
    k = qkv[:, D:2 * D].reshape(batch, seq, D)
    v = qkv[:, 2 * D:].reshape(batch, seq, D)

    for h in range(num_heads):                              # static head loop
        lo = h * head_dim
        qh = q[:, :, lo:lo + head_dim].astype(jnp.bfloat16)
        kh = k[:, :, lo:lo + head_dim].astype(jnp.bfloat16)
        vh = v[:, :, lo:lo + head_dim].astype(jnp.bfloat16)
        s = jnp.einsum('bnd,bmd->bnm', qh, kh,
                       preferred_element_type=jnp.float32)  # (B, N, N)
        if has_mask:
            s = s + mask_ref[...]
        # numerically-safe softmax; reciprocal on the EUP slot.
        s = s - jnp.max(s, axis=-1, keepdims=True)
        e = jnp.exp(s)
        p = e * pl.reciprocal(jnp.sum(e, axis=-1, keepdims=True), approx=True)
        oh = jnp.einsum('bnm,bmd->bnd', p.astype(jnp.bfloat16), vh,
                        preferred_element_type=jnp.float32)
        # write this head's slice directly into the merged-head scratch slab
        attn_ref[:, lo:lo + head_dim] = oh.reshape(batch * seq, head_dim)

    attn_out = linear(attn_ref[...], wo_ref, bo_ref)        # out_proj
    # dropout is identity in eval mode

    # --- residual + LayerNorm1 ---
    x1 = _layer_norm(attn_out + x, g1_ref[0], be1_ref[0])

    # --- FeedForward (relu) + residual + LayerNorm2 ---
    hid = jnp.maximum(linear(x1, w1_ref, b1_ref), 0.0)
    ffn = linear(hid, w2_ref, b2_ref)
    x2 = _layer_norm(ffn + x1, g2_ref[0], be2_ref[0])

    act_ref[...] = x2                                       # carry to next layer

    @pl.when(layer == pl.num_programs(0) - 1)
    def _():
        o_ref[...] = x2.astype(o_ref.dtype)


def transformer_encoder(x, packed_params, num_heads, mask=None):
    """Full TransformerEncoder.forward (all layers) in one pallas_call."""
    B, N, D = x.shape
    L = packed_params[0].shape[0]
    BN = B * N
    x2 = x.reshape(BN, D)        # flatten batch*seq outside (free in XLA)

    inputs = [x2]
    in_specs = [pl.BlockSpec((BN, D), lambda l: (0, 0))]
    if mask is not None:
        inputs.append(mask)
        in_specs.append(pl.BlockSpec((N, N), lambda l: (0, 0)))
    for p in packed_params:      # (L, a, b) stacks; one layer-slice per step
        inputs.append(p)
        in_specs.append(pl.BlockSpec((1,) + p.shape[1:], lambda l: (l, 0, 0)))

    kernel = functools.partial(
        fused_encoder_kernel, batch=B, seq=N,
        num_heads=num_heads, head_dim=D // num_heads,
        has_mask=mask is not None)

    out = pl.pallas_call(
        kernel,
        out_shape=jax.ShapeDtypeStruct((BN, D), x.dtype),
        grid_spec=pltpu.PrefetchScalarGridSpec(
            num_scalar_prefetch=0,
            grid=(L,),                                   # layer axis (sequential)
            in_specs=in_specs,
            out_specs=pl.BlockSpec((BN, D), lambda l: (0, 0)),
            scratch_shapes=[pltpu.VMEM((BN, D), jnp.float32),   # activation carry
                            pltpu.VMEM((BN, D), jnp.float32)],  # merged-head attn
        ),
        compiler_params=pltpu.CompilerParams(
            dimension_semantics=("arbitrary",)),
        # TODO(synk): on v7x add a leading "parallel" batch/sequence axis to
        # use both TensorCores once shapes are large enough to split.
    )(*inputs)
    return out.reshape(B, N, D)


# ----------------------- host-side parameter handling -----------------------

def init_layer_params(key, hidden_dim, dim_feedforward):
    """Deterministic synthetic params, PyTorch (out, in) Linear layout."""
    ks = jax.random.split(key, 12)

    def lin(kw, kb, out_d, in_d):
        w = jax.random.normal(kw, (out_d, in_d), jnp.float32) * 0.02
        b = jax.random.normal(kb, (out_d,), jnp.float32) * 0.02
        return w, b

    wq, bq = lin(ks[0], ks[1], hidden_dim, hidden_dim)
    wk, bk = lin(ks[2], ks[3], hidden_dim, hidden_dim)
    wv, bv = lin(ks[4], ks[5], hidden_dim, hidden_dim)
    wo, bo = lin(ks[6], ks[7], hidden_dim, hidden_dim)
    w1, b1 = lin(ks[8], ks[9], dim_feedforward, hidden_dim)
    w2, b2 = lin(ks[10], ks[11], hidden_dim, dim_feedforward)
    return dict(wq=wq, bq=bq, wk=wk, bk=bk, wv=wv, bv=bv, wo=wo, bo=bo,
                g1=jnp.ones((hidden_dim,), jnp.float32),
                be1=jnp.zeros((hidden_dim,), jnp.float32),
                w1=w1, b1=b1, w2=w2, b2=b2,
                g2=jnp.ones((hidden_dim,), jnp.float32),
                be2=jnp.zeros((hidden_dim,), jnp.float32))


def pack_params(layer_params):
    """Host prep: transpose Linear weights to (in, out), fuse Q/K/V into one
    (D, 3D) matmul, stack along a leading layer axis, cast matmul weights to
    bf16 (biases / LayerNorm params stay f32)."""
    def stack(fn):
        return jnp.stack([fn(p) for p in layer_params], axis=0)

    wqkv = stack(lambda p: jnp.concatenate(
        [p['wq'].T, p['wk'].T, p['wv'].T], axis=1).astype(jnp.bfloat16))   # (L, D, 3D)
    bqkv = stack(lambda p: jnp.concatenate(
        [p['bq'], p['bk'], p['bv']])[None, :])                             # (L, 1, 3D)
    wo = stack(lambda p: p['wo'].T.astype(jnp.bfloat16))                   # (L, D, D)
    bo = stack(lambda p: p['bo'][None, :])
    g1 = stack(lambda p: p['g1'][None, :])
    be1 = stack(lambda p: p['be1'][None, :])
    w1 = stack(lambda p: p['w1'].T.astype(jnp.bfloat16))                   # (L, D, FF)
    b1 = stack(lambda p: p['b1'][None, :])
    w2 = stack(lambda p: p['w2'].T.astype(jnp.bfloat16))                   # (L, FF, D)
    b2 = stack(lambda p: p['b2'][None, :])
    g2 = stack(lambda p: p['g2'][None, :])
    be2 = stack(lambda p: p['be2'][None, :])
    return (wqkv, bqkv, wo, bo, g1, be1, w1, b1, w2, b2, g2, be2)


if __name__ == "__main__":
    # TransformerEncoder(num_layers=2, hidden_dim=32, nhead=4, dim_feedforward=64)
    B, N, D, H, FF, L = 2, 8, 32, 4, 64, 2

    key = jax.random.PRNGKey(0)
    kx, kp = jax.random.split(key)
    x = jax.random.normal(kx, (B, N, D), jnp.float32)

    layer_keys = jax.random.split(kp, L)
    packed = pack_params([init_layer_params(k, D, FF) for k in layer_keys])

    # mask=None matches the PyTorch forward default (no mask buffer is DMA'd).
    out = transformer_encoder(x, packed, num_heads=H, mask=None)
    jax.block_until_ready(out)
    assert out.shape == (B, N, D)
    print("KERNEL_OK")
</pallas_src>

<mosaic_0001>
module attributes {stable_mosaic.version = 11 : i64} {
  func.func @fused_encoder_kernel(%arg0: i32, %arg1: memref<16x32xf32, #tpu.memory_space<vmem>>, %arg2: memref<1x32x96xbf16, #tpu.memory_space<vmem>>, %arg3: memref<1x1x96xf32, #tpu.memory_space<vmem>>, %arg4: memref<1x32x32xbf16, #tpu.memory_space<vmem>>, %arg5: memref<1x1x32xf32, #tpu.memory_space<vmem>>, %arg6: memref<1x1x32xf32, #tpu.memory_space<vmem>>, %arg7: memref<1x1x32xf32, #tpu.memory_space<vmem>>, %arg8: memref<1x32x64xbf16, #tpu.memory_space<vmem>>, %arg9: memref<1x1x64xf32, #tpu.memory_space<vmem>>, %arg10: memref<1x64x32xbf16, #tpu.memory_space<vmem>>, %arg11: memref<1x1x32xf32, #tpu.memory_space<vmem>>, %arg12: memref<1x1x32xf32, #tpu.memory_space<vmem>>, %arg13: memref<1x1x32xf32, #tpu.memory_space<vmem>>, %arg14: memref<16x32xf32, #tpu.memory_space<vmem>>, %arg15: memref<16x32xf32, #tpu.memory_space<vmem>>, %arg16: memref<16x32xf32, #tpu.memory_space<vmem>>) attributes {dimension_semantics = [#tpu.dimension_semantics<arbitrary>], iteration_bounds = array<i64: 2>, scalar_prefetch = 0 : i64, scratch_operands = 2 : i64, tpu.core_type = #tpu.core_type<tc>, window_params = [{pipeline_mode = #tpu.pipeline_mode<synchronous>, transform_indices = @transform_0, window_bounds = array<i64: 16, 32>}, {transform_indices = @transform_1, window_bounds = array<i64: 1, 32, 96>}, {transform_indices = @transform_2, window_bounds = array<i64: 1, 1, 96>}, {transform_indices = @transform_3, window_bounds = array<i64: 1, 32, 32>}, {transform_indices = @transform_4, window_bounds = array<i64: 1, 1, 32>}, {transform_indices = @transform_5, window_bounds = array<i64: 1, 1, 32>}, {transform_indices = @transform_6, window_bounds = array<i64: 1, 1, 32>}, {transform_indices = @transform_7, window_bounds = array<i64: 1, 32, 64>}, {transform_indices = @transform_8, window_bounds = array<i64: 1, 1, 64>}, {transform_indices = @transform_9, window_bounds = array<i64: 1, 64, 32>}, {transform_indices = @transform_10, window_bounds = array<i64: 1, 1, 32>}, {transform_indices = @transform_11, window_bounds = array<i64: 1, 1, 32>}, {transform_indices = @transform_12, window_bounds = array<i64: 1, 1, 32>}, {pipeline_mode = #tpu.pipeline_mode<synchronous>, transform_indices = @transform_13, window_bounds = array<i64: 16, 32>}]} {
    %c0_i32 = arith.constant 0 : i32
    %0 = arith.cmpi eq, %arg0, %c0_i32 : i32
    %1 = arith.extui %0 : i1 to i32
    %c0_i32_0 = arith.constant 0 : i32
    %2 = arith.cmpi ne, %1, %c0_i32_0 : i32
    scf.if %2 {
      %c0_79 = arith.constant 0 : index
      %c0_80 = arith.constant 0 : index
      %189 = vector.load %arg1[%c0_79, %c0_80] : memref<16x32xf32, #tpu.memory_space<vmem>>, vector<16x32xf32>
      %c0_81 = arith.constant 0 : index
      %c0_82 = arith.constant 0 : index
      %190 = vector.load %arg15[%c0_81, %c0_82] : memref<16x32xf32, #tpu.memory_space<vmem>>, vector<16x32xf32>
      tpu.vector_store %arg15[%c0_81, %c0_82], %189 {strides = array<i32>} : memref<16x32xf32, #tpu.memory_space<vmem>>, vector<16x32xf32>,
    } else {
    }
    %c0 = arith.constant 0 : index
    %c0_1 = arith.constant 0 : index
    %3 = vector.load %arg15[%c0, %c0_1] : memref<16x32xf32, #tpu.memory_space<vmem>>, vector<16x32xf32>
    %4 = arith.truncf %3 : vector<16x32xf32> to vector<16x32xbf16>
    %c0_2 = arith.constant 0 : index
    %c0_3 = arith.constant 0 : index
    %c0_4 = arith.constant 0 : index
    %5 = vector.load %arg2[%c0_2, %c0_3, %c0_4] : memref<1x32x96xbf16, #tpu.memory_space<vmem>>, vector<1x32x96xbf16>
    %6 = vector.shape_cast %5 : vector<1x32x96xbf16> to vector<32x96xbf16>
    %cst = arith.constant dense<0.000000e+00> : vector<16x96xf32>
    %7 = tpu.matmul %4, %6, %cst {dimension_numbers = #tpu.dot_dimension_numbers<[1], [0], [0], [1], [0, 0, 1, 1], [], []>} : vector<16x32xbf16>, vector<32x96xbf16>, vector<16x96xf32> -> vector<16x96xf32>
    %c0_5 = arith.constant 0 : index
    %c0_6 = arith.constant 0 : index
    %c0_7 = arith.constant 0 : index
    %8 = vector.load %arg3[%c0_5, %c0_6, %c0_7] : memref<1x1x96xf32, #tpu.memory_space<vmem>>, vector<1x1x96xf32>
    %9 = vector.shape_cast %8 : vector<1x1x96xf32> to vector<1x96xf32>
    %10 = vector.broadcast %9 : vector<1x96xf32> to vector<16x96xf32>
    %11 = arith.addf %7, %10 : vector<16x96xf32>
    %12 = vector.extract_strided_slice %11 {offsets = [0, 0], sizes = [16, 32], strides = [1, 1]} : vector<16x96xf32> to vector<16x32xf32>
    %cst_8 = arith.constant 0.353553385 : f32
    %13 = vector.broadcast %cst_8 : f32 to vector<16x32xf32>
    %14 = arith.mulf %12, %13 : vector<16x32xf32>
    %15 = vector.shape_cast %14 : vector<16x32xf32> to vector<2x8x32xf32>
    %16 = vector.extract_strided_slice %11 {offsets = [0, 32], sizes = [16, 32], strides = [1, 1]} : vector<16x96xf32> to vector<16x32xf32>
    %17 = vector.shape_cast %16 : vector<16x32xf32> to vector<2x8x32xf32>
    %18 = vector.extract_strided_slice %11 {offsets = [0, 64], sizes = [16, 32], strides = [1, 1]} : vector<16x96xf32> to vector<16x32xf32>
    %19 = vector.shape_cast %18 : vector<16x32xf32> to vector<2x8x32xf32>
    %20 = vector.extract_strided_slice %15 {offsets = [0, 0, 0], sizes = [2, 8, 8], strides = [1, 1, 1]} : vector<2x8x32xf32> to vector<2x8x8xf32>
    %21 = arith.truncf %20 : vector<2x8x8xf32> to vector<2x8x8xbf16>
    %22 = vector.extract_strided_slice %17 {offsets = [0, 0, 0], sizes = [2, 8, 8], strides = [1, 1, 1]} : vector<2x8x32xf32> to vector<2x8x8xf32>
    %23 = arith.truncf %22 : vector<2x8x8xf32> to vector<2x8x8xbf16>
    %24 = vector.extract_strided_slice %19 {offsets = [0, 0, 0], sizes = [2, 8, 8], strides = [1, 1, 1]} : vector<2x8x32xf32> to vector<2x8x8xf32>
    %25 = arith.truncf %24 : vector<2x8x8xf32> to vector<2x8x8xbf16>
    "tpu.trace_start"() <{level = 10 : i32, message = "bnd,bmd->bnm"}> : () -> ()
    %cst_9 = arith.constant dense<0.000000e+00> : vector<2x8x8xf32>
    %26 = tpu.matmul %21, %23, %cst_9 {dimension_numbers = #tpu.dot_dimension_numbers<[2], [2], [1], [1], [0, 0, 0, 1, 1, 1], [0], [0]>} : vector<2x8x8xbf16>, vector<2x8x8xbf16>, vector<2x8x8xf32> -> vector<2x8x8xf32>
    "tpu.trace_stop"() : () -> ()
    %cst_10 = arith.constant dense<0xFF800000> : vector<2x8xf32>
    %27 = vector.multi_reduction <maximumf>, %26, %cst_10 [2] : vector<2x8x8xf32> to vector<2x8xf32>
    %28 = vector.shape_cast %27 : vector<2x8xf32> to vector<2x8x1xf32>
    %29 = vector.broadcast %28 : vector<2x8x1xf32> to vector<2x8x8xf32>
    %30 = arith.subf %26, %29 : vector<2x8x8xf32>
    %31 = math.exp %30 : vector<2x8x8xf32>
    %cst_11 = arith.constant dense<0.000000e+00> : vector<2x8xf32>
    %32 = vector.multi_reduction <add>, %31, %cst_11 [2] : vector<2x8x8xf32> to vector<2x8xf32>
    %33 = vector.shape_cast %32 : vector<2x8xf32> to vector<2x8x1xf32>
    %34 = tpu.reciprocal %33 {approx = true} : vector<2x8x1xf32> -> vector<2x8x1xf32>
    %35 = vector.broadcast %34 : vector<2x8x1xf32> to vector<2x8x8xf32>
    %36 = arith.mulf %31, %35 : vector<2x8x8xf32>
    %37 = arith.truncf %36 : vector<2x8x8xf32> to vector<2x8x8xbf16>
    "tpu.trace_start"() <{level = 10 : i32, message = "bnm,bmd->bnd"}> : () -> ()
    %cst_12 = arith.constant dense<0.000000e+00> : vector<2x8x8xf32>
    %38 = tpu.matmul %37, %25, %cst_12 {dimension_numbers = #tpu.dot_dimension_numbers<[2], [1], [1], [2], [0, 0, 0, 1, 1, 2], [0], [0]>} : vector<2x8x8xbf16>, vector<2x8x8xbf16>, vector<2x8x8xf32> -> vector<2x8x8xf32>
    "tpu.trace_stop"() : () -> ()
    %39 = vector.shape_cast %38 : vector<2x8x8xf32> to vector<16x8xf32>
    %c0_13 = arith.constant 0 : index
    %c0_14 = arith.constant 0 : index
    %40 = vector.load %arg16[%c0_13, %c0_14] : memref<16x32xf32, #tpu.memory_space<vmem>>, vector<16x8xf32>
    tpu.vector_store %arg16[%c0_13, %c0_14], %39 {strides = array<i32>} : memref<16x32xf32, #tpu.memory_space<vmem>>, vector<16x8xf32>,
    %41 = vector.extract_strided_slice %15 {offsets = [0, 0, 8], sizes = [2, 8, 8], strides = [1, 1, 1]} : vector<2x8x32xf32> to vector<2x8x8xf32>
    %42 = arith.truncf %41 : vector<2x8x8xf32> to vector<2x8x8xbf16>
    %43 = vector.extract_strided_slice %17 {offsets = [0, 0, 8], sizes = [2, 8, 8], strides = [1, 1, 1]} : vector<2x8x32xf32> to vector<2x8x8xf32>
    %44 = arith.truncf %43 : vector<2x8x8xf32> to vector<2x8x8xbf16>
    %45 = vector.extract_strided_slice %19 {offsets = [0, 0, 8], sizes = [2, 8, 8], strides = [1, 1, 1]} : vector<2x8x32xf32> to vector<2x8x8xf32>
    %46 = arith.truncf %45 : vector<2x8x8xf32> to vector<2x8x8xbf16>
    "tpu.trace_start"() <{level = 10 : i32, message = "bnd,bmd->bnm"}> : () -> ()
    %cst_15 = arith.constant dense<0.000000e+00> : vector<2x8x8xf32>
    %47 = tpu.matmul %42, %44, %cst_15 {dimension_numbers = #tpu.dot_dimension_numbers<[2], [2], [1], [1], [0, 0, 0, 1, 1, 1], [0], [0]>} : vector<2x8x8xbf16>, vector<2x8x8xbf16>, vector<2x8x8xf32> -> vector<2x8x8xf32>
    "tpu.trace_stop"() : () -> ()
    %cst_16 = arith.constant dense<0xFF800000> : vector<2x8xf32>
    %48 = vector.multi_reduction <maximumf>, %47, %cst_16 [2] : vector<2x8x8xf32> to vector<2x8xf32>
    %49 = vector.shape_cast %48 : vector<2x8xf32> to vector<2x8x1xf32>
    %50 = vector.broadcast %49 : vector<2x8x1xf32> to vector<2x8x8xf32>
    %51 = arith.subf %47, %50 : vector<2x8x8xf32>
    %52 = math.exp %51 : vector<2x8x8xf32>
    %cst_17 = arith.constant dense<0.000000e+00> : vector<2x8xf32>
    %53 = vector.multi_reduction <add>, %52, %cst_17 [2] : vector<2x8x8xf32> to vector<2x8xf32>
    %54 = vector.shape_cast %53 : vector<2x8xf32> to vector<2x8x1xf32>
    %55 = tpu.reciprocal %54 {approx = true} : vector<2x8x1xf32> -> vector<2x8x1xf32>
    %56 = vector.broadcast %55 : vector<2x8x1xf32> to vector<2x8x8xf32>
    %57 = arith.mulf %52, %56 : vector<2x8x8xf32>
    %58 = arith.truncf %57 : vector<2x8x8xf32> to vector<2x8x8xbf16>
    "tpu.trace_start"() <{level = 10 : i32, message = "bnm,bmd->bnd"}> : () -> ()
    %cst_18 = arith.constant dense<0.000000e+00> : vector<2x8x8xf32>
    %59 = tpu.matmul %58, %46, %cst_18 {dimension_numbers = #tpu.dot_dimension_numbers<[2], [1], [1], [2], [0, 0, 0, 1, 1, 2], [0], [0]>} : vector<2x8x8xbf16>, vector<2x8x8xbf16>, vector<2x8x8xf32> -> vector<2x8x8xf32>
    "tpu.trace_stop"() : () -> ()
    %60 = vector.shape_cast %59 : vector<2x8x8xf32> to vector<16x8xf32>
    %c0_19 = arith.constant 0 : index
    %c8 = arith.constant 8 : index
    %61 = vector.load %arg16[%c0_19, %c8] : memref<16x32xf32, #tpu.memory_space<vmem>>, vector<16x8xf32>
    tpu.vector_store %arg16[%c0_19, %c8], %60 {strides = array<i32>} : memref<16x32xf32, #tpu.memory_space<vmem>>, vector<16x8xf32>,
    %62 = vector.extract_strided_slice %15 {offsets = [0, 0, 16], sizes = [2, 8, 8], strides = [1, 1, 1]} : vector<2x8x32xf32> to vector<2x8x8xf32>
    %63 = arith.truncf %62 : vector<2x8x8xf32> to vector<2x8x8xbf16>
    %64 = vector.extract_strided_slice %17 {offsets = [0, 0, 16], sizes = [2, 8, 8], strides = [1, 1, 1]} : vector<2x8x32xf32> to vector<2x8x8xf32>
    %65 = arith.truncf %64 : vector<2x8x8xf32> to vector<2x8x8xbf16>
    %66 = vector.extract_strided_slice %19 {offsets = [0, 0, 16], sizes = [2, 8, 8], strides = [1, 1, 1]} : vector<2x8x32xf32> to vector<2x8x8xf32>
    %67 = arith.truncf %66 : vector<2x8x8xf32> to vector<2x8x8xbf16>
    "tpu.trace_start"() <{level = 10 : i32, message = "bnd,bmd->bnm"}> : () -> ()
    %cst_20 = arith.constant dense<0.000000e+00> : vector<2x8x8xf32>
    %68 = tpu.matmul %63, %65, %cst_20 {dimension_numbers = #tpu.dot_dimension_numbers<[2], [2], [1], [1], [0, 0, 0, 1, 1, 1], [0], [0]>} : vector<2x8x8xbf16>, vector<2x8x8xbf16>, vector<2x8x8xf32> -> vector<2x8x8xf32>
    "tpu.trace_stop"() : () -> ()
    %cst_21 = arith.constant dense<0xFF800000> : vector<2x8xf32>
    %69 = vector.multi_reduction <maximumf>, %68, %cst_21 [2] : vector<2x8x8xf32> to vector<2x8xf32>
    %70 = vector.shape_cast %69 : vector<2x8xf32> to vector<2x8x1xf32>
    %71 = vector.broadcast %70 : vector<2x8x1xf32> to vector<2x8x8xf32>
    %72 = arith.subf %68, %71 : vector<2x8x8xf32>
    %73 = math.exp %72 : vector<2x8x8xf32>
    %cst_22 = arith.constant dense<0.000000e+00> : vector<2x8xf32>
    %74 = vector.multi_reduction <add>, %73, %cst_22 [2] : vector<2x8x8xf32> to vector<2x8xf32>
    %75 = vector.shape_cast %74 : vector<2x8xf32> to vector<2x8x1xf32>
    %76 = tpu.reciprocal %75 {approx = true} : vector<2x8x1xf32> -> vector<2x8x1xf32>
    %77 = vector.broadcast %76 : vector<2x8x1xf32> to vector<2x8x8xf32>
    %78 = arith.mulf %73, %77 : vector<2x8x8xf32>
    %79 = arith.truncf %78 : vector<2x8x8xf32> to vector<2x8x8xbf16>
    "tpu.trace_start"() <{level = 10 : i32, message = "bnm,bmd->bnd"}> : () -> ()
    %cst_23 = arith.constant dense<0.000000e+00> : vector<2x8x8xf32>
    %80 = tpu.matmul %79, %67, %cst_23 {dimension_numbers = #tpu.dot_dimension_numbers<[2], [1], [1], [2], [0, 0, 0, 1, 1, 2], [0], [0]>} : vector<2x8x8xbf16>, vector<2x8x8xbf16>, vector<2x8x8xf32> -> vector<2x8x8xf32>
    "tpu.trace_stop"() : () -> ()
    %81 = vector.shape_cast %80 : vector<2x8x8xf32> to vector<16x8xf32>
    %c0_24 = arith.constant 0 : index
    %c16 = arith.constant 16 : index
    %82 = vector.load %arg16[%c0_24, %c16] : memref<16x32xf32, #tpu.memory_space<vmem>>, vector<16x8xf32>
    tpu.vector_store %arg16[%c0_24, %c16], %81 {strides = array<i32>} : memref<16x32xf32, #tpu.memory_space<vmem>>, vector<16x8xf32>,
    %83 = vector.extract_strided_slice %15 {offsets = [0, 0, 24], sizes = [2, 8, 8], strides = [1, 1, 1]} : vector<2x8x32xf32> to vector<2x8x8xf32>
    %84 = arith.truncf %83 : vector<2x8x8xf32> to vector<2x8x8xbf16>
    %85 = vector.extract_strided_slice %17 {offsets = [0, 0, 24], sizes = [2, 8, 8], strides = [1, 1, 1]} : vector<2x8x32xf32> to vector<2x8x8xf32>
    %86 = arith.truncf %85 : vector<2x8x8xf32> to vector<2x8x8xbf16>
    %87 = vector.extract_strided_slice %19 {offsets = [0, 0, 24], sizes = [2, 8, 8], strides = [1, 1, 1]} : vector<2x8x32xf32> to vector<2x8x8xf32>
    %88 = arith.truncf %87 : vector<2x8x8xf32> to vector<2x8x8xbf16>
    "tpu.trace_start"() <{level = 10 : i32, message = "bnd,bmd->bnm"}> : () -> ()
    %cst_25 = arith.constant dense<0.000000e+00> : vector<2x8x8xf32>
    %89 = tpu.matmul %84, %86, %cst_25 {dimension_numbers = #tpu.dot_dimension_numbers<[2], [2], [1], [1], [0, 0, 0, 1, 1, 1], [0], [0]>} : vector<2x8x8xbf16>, vector<2x8x8xbf16>, vector<2x8x8xf32> -> vector<2x8x8xf32>
    "tpu.trace_stop"() : () -> ()
    %cst_26 = arith.constant dense<0xFF800000> : vector<2x8xf32>
    %90 = vector.multi_reduction <maximumf>, %89, %cst_26 [2] : vector<2x8x8xf32> to vector<2x8xf32>
    %91 = vector.shape_cast %90 : vector<2x8xf32> to vector<2x8x1xf32>
    %92 = vector.broadcast %91 : vector<2x8x1xf32> to vector<2x8x8xf32>
    %93 = arith.subf %89, %92 : vector<2x8x8xf32>
    %94 = math.exp %93 : vector<2x8x8xf32>
    %cst_27 = arith.constant dense<0.000000e+00> : vector<2x8xf32>
    %95 = vector.multi_reduction <add>, %94, %cst_27 [2] : vector<2x8x8xf32> to vector<2x8xf32>
    %96 = vector.shape_cast %95 : vector<2x8xf32> to vector<2x8x1xf32>
    %97 = tpu.reciprocal %96 {approx = true} : vector<2x8x1xf32> -> vector<2x8x1xf32>
    %98 = vector.broadcast %97 : vector<2x8x1xf32> to vector<2x8x8xf32>
    %99 = arith.mulf %94, %98 : vector<2x8x8xf32>
    %100 = arith.truncf %99 : vector<2x8x8xf32> to vector<2x8x8xbf16>
    "tpu.trace_start"() <{level = 10 : i32, message = "bnm,bmd->bnd"}> : () -> ()
    %cst_28 = arith.constant dense<0.000000e+00> : vector<2x8x8xf32>
    %101 = tpu.matmul %100, %88, %cst_28 {dimension_numbers = #tpu.dot_dimension_numbers<[2], [1], [1], [2], [0, 0, 0, 1, 1, 2], [0], [0]>} : vector<2x8x8xbf16>, vector<2x8x8xbf16>, vector<2x8x8xf32> -> vector<2x8x8xf32>
    "tpu.trace_stop"() : () -> ()
    %102 = vector.shape_cast %101 : vector<2x8x8xf32> to vector<16x8xf32>
    %c0_29 = arith.constant 0 : index
    %c24 = arith.constant 24 : index
    %103 = vector.load %arg16[%c0_29, %c24] : memref<16x32xf32, #tpu.memory_space<vmem>>, vector<16x8xf32>
    tpu.vector_store %arg16[%c0_29, %c24], %102 {strides = array<i32>} : memref<16x32xf32, #tpu.memory_space<vmem>>, vector<16x8xf32>,
    %c0_30 = arith.constant 0 : index
    %c0_31 = arith.constant 0 : index
    %104 = vector.load %arg16[%c0_30, %c0_31] : memref<16x32xf32, #tpu.memory_space<vmem>>, vector<16x32xf32>
    %105 = arith.truncf %104 : vector<16x32xf32> to vector<16x32xbf16>
    %c0_32 = arith.constant 0 : index
    %c0_33 = arith.constant 0 : index
    %c0_34 = arith.constant 0 : index
    %106 = vector.load %arg4[%c0_32, %c0_33, %c0_34] : memref<1x32x32xbf16, #tpu.memory_space<vmem>>, vector<1x32x32xbf16>
    %107 = vector.shape_cast %106 : vector<1x32x32xbf16> to vector<32x32xbf16>
    %cst_35 = arith.constant dense<0.000000e+00> : vector<16x32xf32>
    %108 = tpu.matmul %105, %107, %cst_35 {dimension_numbers = #tpu.dot_dimension_numbers<[1], [0], [0], [1], [0, 0, 1, 1], [], []>} : vector<16x32xbf16>, vector<32x32xbf16>, vector<16x32xf32> -> vector<16x32xf32>
    %c0_36 = arith.constant 0 : index
    %c0_37 = arith.constant 0 : index
    %c0_38 = arith.constant 0 : index
    %109 = vector.load %arg5[%c0_36, %c0_37, %c0_38] : memref<1x1x32xf32, #tpu.memory_space<vmem>>, vector<1x1x32xf32>
    %110 = vector.shape_cast %109 : vector<1x1x32xf32> to vector<1x32xf32>
    %111 = vector.broadcast %110 : vector<1x32xf32> to vector<16x32xf32>
    %112 = arith.addf %108, %111 : vector<16x32xf32>
    %113 = arith.addf %112, %3 : vector<16x32xf32>
    %c0_39 = arith.constant 0 : index
    %c0_40 = arith.constant 0 : index
    %c0_41 = arith.constant 0 : index
    %114 = vector.load %arg6[%c0_39, %c0_40, %c0_41] : memref<1x1x32xf32, #tpu.memory_space<vmem>>, vector<1x1x32xf32>
    %115 = vector.shape_cast %114 : vector<1x1x32xf32> to vector<1x32xf32>
    %c0_42 = arith.constant 0 : index
    %c0_43 = arith.constant 0 : index
    %c0_44 = arith.constant 0 : index
    %116 = vector.load %arg7[%c0_42, %c0_43, %c0_44] : memref<1x1x32xf32, #tpu.memory_space<vmem>>, vector<1x1x32xf32>
    %117 = vector.shape_cast %116 : vector<1x1x32xf32> to vector<1x32xf32>
    %cst_45 = arith.constant dense<0.000000e+00> : vector<16xf32>
    %118 = vector.multi_reduction <add>, %113, %cst_45 [1] : vector<16x32xf32> to vector<16xf32>
    %119 = vector.shape_cast %118 : vector<16xf32> to vector<16x1xf32>
    %cst_46 = arith.constant 3.200000e+01 : f32
    %120 = vector.broadcast %cst_46 : f32 to vector<16x1xf32>
    %121 = arith.divf %119, %120 : vector<16x1xf32>
    %122 = vector.broadcast %121 : vector<16x1xf32> to vector<16x32xf32>
    %123 = arith.subf %113, %122 : vector<16x32xf32>
    %124 = arith.mulf %123, %123 : vector<16x32xf32>
    %cst_47 = arith.constant dense<0.000000e+00> : vector<16xf32>
    %125 = vector.multi_reduction <add>, %124, %cst_47 [1] : vector<16x32xf32> to vector<16xf32>
    %126 = vector.shape_cast %125 : vector<16xf32> to vector<16x1xf32>
    %cst_48 = arith.constant 3.200000e+01 : f32
    %127 = vector.broadcast %cst_48 : f32 to vector<16x1xf32>
    %128 = arith.divf %126, %127 : vector<16x1xf32>
    %129 = vector.broadcast %121 : vector<16x1xf32> to vector<16x32xf32>
    %130 = arith.subf %113, %129 : vector<16x32xf32>
    %cst_49 = arith.constant 9.99999974E-6 : f32
    %131 = vector.broadcast %cst_49 : f32 to vector<16x1xf32>
    %132 = arith.addf %128, %131 : vector<16x1xf32>
    %133 = math.rsqrt %132 : vector<16x1xf32>
    %134 = vector.broadcast %133 : vector<16x1xf32> to vector<16x32xf32>
    %135 = arith.mulf %130, %134 : vector<16x32xf32>
    %136 = vector.broadcast %115 : vector<1x32xf32> to vector<16x32xf32>
    %137 = arith.mulf %135, %136 : vector<16x32xf32>
    %138 = vector.broadcast %117 : vector<1x32xf32> to vector<16x32xf32>
    %139 = arith.addf %137, %138 : vector<16x32xf32>
    %140 = arith.truncf %139 : vector<16x32xf32> to vector<16x32xbf16>
    %c0_50 = arith.constant 0 : index
    %c0_51 = arith.constant 0 : index
    %c0_52 = arith.constant 0 : index
    %141 = vector.load %arg8[%c0_50, %c0_51, %c0_52] : memref<1x32x64xbf16, #tpu.memory_space<vmem>>, vector<1x32x64xbf16>
    %142 = vector.shape_cast %141 : vector<1x32x64xbf16> to vector<32x64xbf16>
    %cst_53 = arith.constant dense<0.000000e+00> : vector<16x64xf32>
    %143 = tpu.matmul %140, %142, %cst_53 {dimension_numbers = #tpu.dot_dimension_numbers<[1], [0], [0], [1], [0, 0, 1, 1], [], []>} : vector<16x32xbf16>, vector<32x64xbf16>, vector<16x64xf32> -> vector<16x64xf32>
    %c0_54 = arith.constant 0 : index
    %c0_55 = arith.constant 0 : index
    %c0_56 = arith.constant 0 : index
    %144 = vector.load %arg9[%c0_54, %c0_55, %c0_56] : memref<1x1x64xf32, #tpu.memory_space<vmem>>, vector<1x1x64xf32>
    %145 = vector.shape_cast %144 : vector<1x1x64xf32> to vector<1x64xf32>
    %146 = vector.broadcast %145 : vector<1x64xf32> to vector<16x64xf32>
    %147 = arith.addf %143, %146 : vector<16x64xf32>
    %cst_57 = arith.constant 0.000000e+00 : f32
    %148 = vector.broadcast %cst_57 : f32 to vector<16x64xf32>
    %149 = arith.maximumf %147, %148 : vector<16x64xf32>
    %150 = arith.truncf %149 : vector<16x64xf32> to vector<16x64xbf16>
    %c0_58 = arith.constant 0 : index
    %c0_59 = arith.constant 0 : index
    %c0_60 = arith.constant 0 : index
    %151 = vector.load %arg10[%c0_58, %c0_59, %c0_60] : memref<1x64x32xbf16, #tpu.memory_space<vmem>>, vector<1x64x32xbf16>
    %152 = vector.shape_cast %151 : vector<1x64x32xbf16> to vector<64x32xbf16>
    %cst_61 = arith.constant dense<0.000000e+00> : vector<16x32xf32>
    %153 = tpu.matmul %150, %152, %cst_61 {dimension_numbers = #tpu.dot_dimension_numbers<[1], [0], [0], [1], [0, 0, 1, 1], [], []>} : vector<16x64xbf16>, vector<64x32xbf16>, vector<16x32xf32> -> vector<16x32xf32>
    %c0_62 = arith.constant 0 : index
    %c0_63 = arith.constant 0 : index
    %c0_64 = arith.constant 0 : index
    %154 = vector.load %arg11[%c0_62, %c0_63, %c0_64] : memref<1x1x32xf32, #tpu.memory_space<vmem>>, vector<1x1x32xf32>
    %155 = vector.shape_cast %154 : vector<1x1x32xf32> to vector<1x32xf32>
    %156 = vector.broadcast %155 : vector<1x32xf32> to vector<16x32xf32>
    %157 = arith.addf %153, %156 : vector<16x32xf32>
    %158 = arith.addf %157, %139 : vector<16x32xf32>
    %c0_65 = arith.constant 0 : index
    %c0_66 = arith.constant 0 : index
    %c0_67 = arith.constant 0 : index
    %159 = vector.load %arg12[%c0_65, %c0_66, %c0_67] : memref<1x1x32xf32, #tpu.memory_space<vmem>>, vector<1x1x32xf32>
    %160 = vector.shape_cast %159 : vector<1x1x32xf32> to vector<1x32xf32>
    %c0_68 = arith.constant 0 : index
    %c0_69 = arith.constant 0 : index
    %c0_70 = arith.constant 0 : index
    %161 = vector.load %arg13[%c0_68, %c0_69, %c0_70] : memref<1x1x32xf32, #tpu.memory_space<vmem>>, vector<1x1x32xf32>
    %162 = vector.shape_cast %161 : vector<1x1x32xf32> to vector<1x32xf32>
    %cst_71 = arith.constant dense<0.000000e+00> : vector<16xf32>
    %163 = vector.multi_reduction <add>, %158, %cst_71 [1] : vector<16x32xf32> to vector<16xf32>
    %164 = vector.shape_cast %163 : vector<16xf32> to vector<16x1xf32>
    %cst_72 = arith.constant 3.200000e+01 : f32
    %165 = vector.broadcast %cst_72 : f32 to vector<16x1xf32>
    %166 = arith.divf %164, %165 : vector<16x1xf32>
    %167 = vector.broadcast %166 : vector<16x1xf32> to vector<16x32xf32>
    %168 = arith.subf %158, %167 : vector<16x32xf32>
    %169 = arith.mulf %168, %168 : vector<16x32xf32>
    %cst_73 = arith.constant dense<0.000000e+00> : vector<16xf32>
    %170 = vector.multi_reduction <add>, %169, %cst_73 [1] : vector<16x32xf32> to vector<16xf32>
    %171 = vector.shape_cast %170 : vector<16xf32> to vector<16x1xf32>
    %cst_74 = arith.constant 3.200000e+01 : f32
    %172 = vector.broadcast %cst_74 : f32 to vector<16x1xf32>
    %173 = arith.divf %171, %172 : vector<16x1xf32>
    %174 = vector.broadcast %166 : vector<16x1xf32> to vector<16x32xf32>
    %175 = arith.subf %158, %174 : vector<16x32xf32>
    %cst_75 = arith.constant 9.99999974E-6 : f32
    %176 = vector.broadcast %cst_75 : f32 to vector<16x1xf32>
    %177 = arith.addf %173, %176 : vector<16x1xf32>
    %178 = math.rsqrt %177 : vector<16x1xf32>
    %179 = vector.broadcast %178 : vector<16x1xf32> to vector<16x32xf32>
    %180 = arith.mulf %175, %179 : vector<16x32xf32>
    %181 = vector.broadcast %160 : vector<1x32xf32> to vector<16x32xf32>
    %182 = arith.mulf %180, %181 : vector<16x32xf32>
    %183 = vector.broadcast %162 : vector<1x32xf32> to vector<16x32xf32>
    %184 = arith.addf %182, %183 : vector<16x32xf32>
    %c0_76 = arith.constant 0 : index
    %c0_77 = arith.constant 0 : index
    %185 = vector.load %arg15[%c0_76, %c0_77] : memref<16x32xf32, #tpu.memory_space<vmem>>, vector<16x32xf32>
    tpu.vector_store %arg15[%c0_76, %c0_77], %184 {strides = array<i32>} : memref<16x32xf32, #tpu.memory_space<vmem>>, vector<16x32xf32>,
    %c1_i32 = arith.constant 1 : i32
    %186 = arith.cmpi eq, %arg0, %c1_i32 : i32
    %187 = arith.extui %186 : i1 to i32
    %c0_i32_78 = arith.constant 0 : i32
    %188 = arith.cmpi ne, %187, %c0_i32_78 : i32
    scf.if %188 {
      %c0_79 = arith.constant 0 : index
      %c0_80 = arith.constant 0 : index
      %189 = vector.load %arg14[%c0_79, %c0_80] : memref<16x32xf32, #tpu.memory_space<vmem>>, vector<16x32xf32>
      tpu.vector_store %arg14[%c0_79, %c0_80], %184 {strides = array<i32>} : memref<16x32xf32, #tpu.memory_space<vmem>>, vector<16x32xf32>,
    } else {
    }
    return
  }
  func.func @transform_0(%arg0: i32) -> (i32, i32) {
    %c0_i32 = arith.constant 0 : i32
    %c0_i32_0 = arith.constant 0 : i32
    %c0_i32_1 = arith.constant 0 : i32
    return %c0_i32, %c0_i32_0 : i32, i32
  }
  func.func @transform_1(%arg0: i32) -> (i32, i32, i32) {
    %c0_i32 = arith.constant 0 : i32
    %c0_i32_0 = arith.constant 0 : i32
    %c0_i32_1 = arith.constant 0 : i32
    return %arg0, %c0_i32, %c0_i32_0 : i32, i32, i32
  }
  func.func @transform_2(%arg0: i32) -> (i32, i32, i32) {
    %c0_i32 = arith.constant 0 : i32
    %c0_i32_0 = arith.constant 0 : i32
    %c0_i32_1 = arith.constant 0 : i32
    return %arg0, %c0_i32, %c0_i32_0 : i32, i32, i32
  }
  func.func @transform_3(%arg0: i32) -> (i32, i32, i32) {
    %c0_i32 = arith.constant 0 : i32
    %c0_i32_0 = arith.constant 0 : i32
    %c0_i32_1 = arith.constant 0 : i32
    return %arg0, %c0_i32, %c0_i32_0 : i32, i32, i32
  }
  func.func @transform_4(%arg0: i32) -> (i32, i32, i32) {
    %c0_i32 = arith.constant 0 : i32
    %c0_i32_0 = arith.constant 0 : i32
    %c0_i32_1 = arith.constant 0 : i32
    return %arg0, %c0_i32, %c0_i32_0 : i32, i32, i32
  }
  func.func @transform_5(%arg0: i32) -> (i32, i32, i32) {
    %c0_i32 = arith.constant 0 : i32
    %c0_i32_0 = arith.constant 0 : i32
    %c0_i32_1 = arith.constant 0 : i32
    return %arg0, %c0_i32, %c0_i32_0 : i32, i32, i32
  }
  func.func @transform_6(%arg0: i32) -> (i32, i32, i32) {
    %c0_i32 = arith.constant 0 : i32
    %c0_i32_0 = arith.constant 0 : i32
    %c0_i32_1 = arith.constant 0 : i32
    return %arg0, %c0_i32, %c0_i32_0 : i32, i32, i32
  }
  func.func @transform_7(%arg0: i32) -> (i32, i32, i32) {
    %c0_i32 = arith.constant 0 : i32
    %c0_i32_0 = arith.constant 0 : i32
    %c0_i32_1 = arith.constant 0 : i32
    return %arg0, %c0_i32, %c0_i32_0 : i32, i32, i32
  }
  func.func @transform_8(%arg0: i32) -> (i32, i32, i32) {
    %c0_i32 = arith.constant 0 : i32
    %c0_i32_0 = arith.constant 0 : i32
    %c0_i32_1 = arith.constant 0 : i32
    return %arg0, %c0_i32, %c0_i32_0 : i32, i32, i32
  }
  func.func @transform_9(%arg0: i32) -> (i32, i32, i32) {
    %c0_i32 = arith.constant 0 : i32
    %c0_i32_0 = arith.constant 0 : i32
    %c0_i32_1 = arith.constant 0 : i32
    return %arg0, %c0_i32, %c0_i32_0 : i32, i32, i32
  }
  func.func @transform_10(%arg0: i32) -> (i32, i32, i32) {
    %c0_i32 = arith.constant 0 : i32
    %c0_i32_0 = arith.constant 0 : i32
    %c0_i32_1 = arith.constant 0 : i32
    return %arg0, %c0_i32, %c0_i32_0 : i32, i32, i32
  }
  func.func @transform_11(%arg0: i32) -> (i32, i32, i32) {
    %c0_i32 = arith.constant 0 : i32
    %c0_i32_0 = arith.constant 0 : i32
    %c0_i32_1 = arith.constant 0 : i32
    return %arg0, %c0_i32, %c0_i32_0 : i32, i32, i32
  }
  func.func @transform_12(%arg0: i32) -> (i32, i32, i32) {
    %c0_i32 = arith.constant 0 : i32
    %c0_i32_0 = arith.constant 0 : i32
    %c0_i32_1 = arith.constant 0 : i32
    return %arg0, %c0_i32, %c0_i32_0 : i32, i32, i32
  }
  func.func @transform_13(%arg0: i32) -> (i32, i32) {
    %c0_i32 = arith.constant 0 : i32
    %c0_i32_0 = arith.constant 0 : i32
    %c0_i32_1 = arith.constant 0 : i32
    return %c0_i32, %c0_i32_0 : i32, i32
  }
}

</mosaic_0001>

<bundles_post_ra>
// kernel: tpu_custom_call.1
= control target key start
LH: loop header
LB: loop body
LE: loop exit
PB: predicated region body
PF: predicated region fallthrough
CT: control target
= control target key end

     0   :  { %s2594_s0 = inlined_call_operand.hbm [shape: f32[16,32], index: 0, kind: input, shape index: {}]   ;;  %s2595_s1 = inlined_call_operand.vmem [shape: bf16[2,32,96], index: 1, kind: input, shape index: {}]   ;;  %s2596_s2 = inlined_call_operand.hbm [shape: f32[2,1,96], index: 2, kind: input, shape index: {}]   ;;  %s2597_s3 = inlined_call_operand.vmem [shape: bf16[2,32,32], index: 3, kind: input, shape index: {}]   ;;  %s2598_s4 = inlined_call_operand.vmem [shape: f32[2,1,32], index: 4, kind: input, shape index: {}]   ;;  %s2599_s5 = inlined_call_operand.hbm [shape: f32[2,1,32], index: 5, kind: input, shape index: {}]   ;;  %s2600_s6 = inlined_call_operand.vmem [shape: f32[2,1,32], index: 6, kind: input, shape index: {}]   ;;  %s2601_s7 = inlined_call_operand.vmem [shape: bf16[2,32,64], index: 7, kind: input, shape index: {}]   ;;  %s2602_s8 = inlined_call_operand.vmem [shape: f32[2,1,64], index: 8, kind: input, shape index: {}]   ;;  %s2603_s9 = inlined_call_operand.vmem [shape: bf16[2,64,32], index: 9, kind: input, shape index: {}]   ;;  %s2604_s10 = inlined_call_operand.vmem [shape: f32[2,1,32], index: 10, kind: input, shape index: {}]   ;;  %s2605_s11 = inlined_call_operand.hbm [shape: f32[2,1,32], index: 11, kind: input, shape index: {}]   ;;  %s2606_s12 = inlined_call_operand.vmem [shape: f32[2,1,32], index: 12, kind: input, shape index: {}]   ;;  %s2607_s13 = inlined_call_operand.hbm [shape: f32[16,32], index: 13, kind: output, shape index: {}]  }
   0x1   :  { %2611 = sst [smem:[#allocation20_spill]] %s2594_s0 }
   0x2   :  { %2612 = sst [smem:[#allocation21_spill]] %s2595_s1 }
   0x3   :  { %2613 = sst [smem:[#allocation22_spill]] %s2596_s2 }
   0x4   :  { %2614 = sst [smem:[#allocation23_spill]] %s2597_s3 }
   0x5   :  { %2615 = sst [smem:[#allocation24_spill]] %s2604_s10 }
   0x6   :  { %2616 = sst [smem:[#allocation25_spill]] %s2606_s12 }
   0x7   :  { %2617 = sst [smem:[#allocation26_spill]] %s2607_s13 }
   0x8   :  { %18 = vsyncpa [#allocation5], 0 }
   0x9   :  { %19 = vsyncpa [#allocation8], 0 }
   0xa   :  { %21 = vsyncpa [#allocation8 + $0x1], 0 }
   0xb   :  { %22 = vsyncpa [#allocation11], 0 }
   0xc   :  { %24 = vsyncpa [#allocation11 + $0x1], 0 }
   0xd   :  { %25 = vsyncpa [#allocation6], 0  ;;  %s2204_s25 = smov 0   ;;  %s2206_s26 = smov 0  }
   0xe   :  { %s2208_s27 = smov 0   ;;  %s2210_s28 = smov 0  }
   0xf LB: > { %2618 = sst [smem:[#allocation17_spill]] %s2108_s27  ;;  %s2225_s29 = sadd.s32 1, %s2112_s28   ;;  %s2112_s28 = sphi %s2210_s28, %s2638_s28   ;;  %s2108_s27 = sphi %s2208_s27, %s2640_s27   ;;  %s2104_s26 = sphi %s2206_s26, %s2642_s26   ;;  %s2100_s25 = sphi %s2204_s25, %s2641_s25  }
  0x10   : > { %2619 = sst [smem:[#allocation18_spill]] %s2225_s29  ;;  %s85_s30 = sadd.s32 1, %s2108_s27 }
  0x11   : > { %s82_s14 = ssub.s32 %s2112_s28, %s2225_s29  ;;  %p92_p0 = scmp.ne.s32.totalorder %s2108_s27, %s2104_s26 }
  0x12   : > { %p83_p1 = scmp.eq.s32.totalorder %s82_s14, 0  ;;  %p93_p2 = scmp.eq.s32.totalorder %s2112_s28, 0 }
  0x13   : > { %p98_p3 = scmp.ne.s32.totalorder %s2104_s26, %s2100_s25  ;;  %p1812_p5 = scmp.lt.s32.totalorder %s2112_s28, 2 }
  0x14   : > { %s2236_s15 = scalar_select %p83_p1, %s2108_s27, %s85_s30  }
  0x15   : > { %p94_p4 = por %p93_p2, %p92_p0  ;;  %s425_s16 = sand.u32 1, %s2112_s28  }
  0x16   : > { %2620 = sst [smem:[#allocation19_spill]] %s2236_s15  ;;  %s2241_s17 = sand.u32 1, %s2108_s27  }
  0x17   : > { %s2621_s2 = sld [smem:[#allocation22_spill]]  ;;  %s428_s21 = scalar_lea.vmem [#allocation7], %s2241_s17 }
  0x18   : > { %s435_s22 = sshll.u32 %s428_s21, 4  ;;  %p2248_p6 = pnand %p1812_p5, %p94_p4  ;;  %s436_s22 = int_to_ptr.vmem [resolvable:$true] %s435_s22 }
  0x19   : > { %s2253_s30 = sadd.s32 4294967295, %s2112_s28   ;;  %p1690_p7 = scmp.ge.s32.totalorder %s2112_s28, 1 }
  0x1a   : > { %p99_p8 = scmp.eq.s32.totalorder %s2253_s30, 0  ;;  %s2257_s14 = scalar_lea.sflag [#allocation8], %s425_s16 }
  0x1b   : > { %p1922_p10 = pneg %p2248_p6 }
  0x1d   : > { %s431_s20 = scalar_lea.hbm %s2621_s2, %s2112_s28  ;;  %s1925_s15 = scalar_lea.hbm %s2621_s2, 2 }
  0x1e   : > { %s433_s23 = sshll.u32 %s431_s20, 4  ;;  %s434_s23 = int_to_ptr.hbm [resolvable:$true] %s433_s23 }
  0x1f   : > { %s1918_s18 = sshra.s32 %s434_s23, 4  ;;  %s1919_s18 = int_to_ptr.hbm [resolvable:$true] %s1918_s18 }
  0x20   : > { %s1920_s19 = scalar_lea.hbm %s1919_s18, 1  ;;  %p1926_p13 = scmp.lt.s32.totalorder %s1919_s18, %s2621_s2 }
  0x21   : > { %p1921_p9 = scmp.ne.s32.totalorder %s1919_s18, %s1920_s19  ;;  %p1927_p0 = scmp.lt.s32.totalorder %s1925_s15, %s1920_s19 }
  0x23   : > { %p1923_p11 = pnand %p1922_p10, %p1921_p9  ;;  %p1928_p1 = por %p1927_p0, %p1926_p13 }
  0x25   : > { %p1924_p12 = pneg %p1923_p11 }
  0x27   : > { %p1929_p2 = pnand %p1928_p1, %p1924_p12 }
  0x29   : > { %1932 = shalt.err (!%p1929_p2)
}
  0x2a   : > { %1804 = dma.hbm_to_vmem [thread:$0]  (!%p2248_p6), %s434_s23, 16, %s436_s22, %s2257_s14  }
  0x2b   : > { %p2278_p4 = por %p99_p8, %p98_p3  ;;  %p390_p5 = scmp.lt.s32.totalorder %s2112_s28, 3 }
  0x2c   : > { %p1691_p9 = scmp.ne.s32.totalorder %s2253_s30, 0  ;;  %s2624_s0 = sld [smem:[#allocation20_spill]] }
  0x2d   : > { %p2289_p11 = pnand %p1690_p7, %p390_p5  ;;  %s2114_s25 = smov [#allocation4]  }
  0x2e   : > { %s403_s22 = sshll.u32 %s2114_s25, 4  ;;  %s462_s20 = scalar_lea.hbm %s2599_s5, %s2112_s28  ;;  %s404_s22 = int_to_ptr.vmem [resolvable:$true] %s403_s22 }
  0x2f   : > { %p1797_p12 = pneg %p2289_p11  ;;  %s459_s21 = scalar_lea.vmem [#allocation9], %s2241_s17 }
  0x30   : > { %s466_s29 = sshll.u32 %s459_s21, 4  ;;  %s464_s15 = sshll.u32 %s462_s20, 4  ;;  %s465_s15 = int_to_ptr.hbm [resolvable:$true] %s464_s15  ;;  %s467_s29 = int_to_ptr.vmem [resolvable:$true] %s466_s29 }
  0x31   : > { %p1798_p3 = pnand %p1797_p12, %p99_p8  ;;  %s2116_s2 = smov 8  }
  0x32   : > { %s401_s16 = sshll.u32 %s2624_s0, 4  ;;  %s2115_s0 = smov 128   ;;  %s402_s16 = int_to_ptr.hbm [resolvable:$true] %s401_s16 }
  0x33   : > { %1800 = dma.hbm_to_vmem [thread:$0]  (!%p1798_p3), %s402_s16, 256, %s404_s22, [#allocation5], %s2115_s0, %s2115_s0, %s2116_s2  }
  0x34   : > { %s1978_s13 = sshra.s32 %s465_s15, 4  ;;  %s1985_s23 = scalar_lea.hbm %s2599_s5, 2  ;;  %s1979_s13 = int_to_ptr.hbm [resolvable:$true] %s1978_s13 }
  0x35   : > { %s1980_s12 = scalar_lea.hbm %s1979_s13, 1  ;;  %p1986_p1 = scmp.lt.s32.totalorder %s1979_s13, %s2599_s5 }
  0x36   : > { %p1981_p7 = scmp.ne.s32.totalorder %s1979_s13, %s1980_s12  ;;  %p1987_p2 = scmp.lt.s32.totalorder %s1985_s23, %s1980_s12 }
  0x38   : > { %p1983_p13 = pnand %p1981_p7, %p1922_p10  ;;  %p1988_p5 = por %p1987_p2, %p1986_p1 }
  0x3a   : > { %p1984_p0 = pneg %p1983_p13 }
  0x3c   : > { %p1989_p12 = pnand %p1988_p5, %p1984_p0 }
  0x3e   : > { %1992 = shalt.err (!%p1989_p12)
}
  0x3f   : > { %1807 = dma.hbm_to_vmem [thread:$0]  (!%p2248_p6), %s465_s15, 16, %s467_s29, %s2257_s14  }
  0x40   : > { %s513_s10 = scalar_lea.hbm %s2605_s11, %s2112_s28  ;;  %s510_s16 = scalar_lea.vmem [#allocation10], %s2241_s17 }
  0x41   : > { %s517_s22 = sshll.u32 %s510_s16, 4  ;;  %s515_s20 = sshll.u32 %s513_s10, 4  ;;  %s518_s22 = int_to_ptr.vmem [resolvable:$true] %s517_s22  ;;  %s516_s20 = int_to_ptr.hbm [resolvable:$true] %s515_s20 }
  0x42   : > { %s508_s12 = scalar_lea.sflag [#allocation11], %s2241_s17  ;;  %s2008_s13 = sshra.s32 %s516_s20, 4  ;;  %s2009_s13 = int_to_ptr.hbm [resolvable:$true] %s2008_s13 }
  0x43   : > { %s2010_s25 = scalar_lea.hbm %s2009_s13, 1  ;;  %s2015_s29 = scalar_lea.hbm %s2605_s11, 2 }
  0x44   : > { %p2011_p3 = scmp.ne.s32.totalorder %s2009_s13, %s2010_s25  ;;  %p2016_p0 = scmp.lt.s32.totalorder %s2009_s13, %s2605_s11 }
  0x45   : > { %p2017_p1 = scmp.lt.s32.totalorder %s2015_s29, %s2010_s25 }
  0x46   : > { %p2013_p7 = pnand %p2011_p3, %p1922_p10 }
  0x47   : > { %p2018_p2 = por %p2017_p1, %p2016_p0 }
  0x48   : > { %p2014_p13 = pneg %p2013_p7 }
  0x4a   : > { %p2019_p5 = pnand %p2018_p2, %p2014_p13 }
  0x4c   : > { %2022 = shalt.err (!%p2019_p5)
}
  0x4d   : > { %1810 = dma.hbm_to_vmem [thread:$0]  (!%p2248_p6), %s516_s20, 16, %s518_s22, %s508_s12  }
  0x4e   : > { %532 = sbr.rel (%p2289_p11) target bundleno = 2084 (0x824), region = 72 }
  0x53   : > { %2083 = dma.done.wait (%p99_p8), [#allocation5], 256  }
  0x54   : > { %2085 = vsyncadd (%p99_p8), [#allocation5], 4294967040  ;;  %s539_s17 = sand.u32 1, %s2253_s30   ;;  %s2339_s19 = sand.u32 1, %s2104_s26  }
  0x55   : > { %s540_s21 = scalar_lea.sflag [#allocation8], %s539_s17 }
  0x56   : > { %2087 = dma.done.wait (%p2278_p4), %s540_s21, 32  }
  0x57   : > { %2089 = vsyncadd (%p2278_p4), %s540_s21, 4294967264  ;;  %s558_s18 = scalar_lea.sflag [#allocation11], %s2339_s19 }
  0x58   : > { %2091 = dma.done.wait (%p2278_p4), %s558_s18, 16  }
  0x59   : > { %2093 = vsyncadd (%p2278_p4), %s558_s18, 4294967280  ;;  %p641_p6 = scmp.lt.s32.totalorder %s2253_s30, 1  ;;  %s2626_s1 = sld [smem:[#allocation21_spill]] }
  0x5a   : > { %s2627_s3 = sld [smem:[#allocation23_spill]] }
  0x5b   : > { %s2355_s10 = scalar_select %p641_p6, %s2253_s30, 1 }
  0x5d   : > { %s1769_s16 = sshll.u32 %s2355_s10, 4  ;;  %s664_s24 = scalar_lea.vmem %s2602_s8, %s2355_s10 }
  0x5e   : > { %s2377_s2 = scalar_lea.vmem %s2601_s7, %s1769_s16  ;;  %s1772_s13 = sshll.u32 %s2355_s10, 5 }
  0x5f   : > { %s645_s25 = scalar_lea.vmem %s2626_s1, %s1769_s16  ;;  %s2387_s23 = scalar_lea.vmem %s2603_s9, %s1772_s13 }
  0x60   : > { %s2368_s29 = scalar_lea.vmem %s2627_s3, %s1769_s16  ;;  %s2628_s1 = sld [smem:[#allocation24_spill]] }
  0x61   : > { %s2629_s3 = sld [smem:[#allocation25_spill]] }
  0x63   : > { %680 = sbr.rel (%p1691_p9) target bundleno = 107 (0x6b), region = 92 }
  0x66   : > { %s672_s15 = scalar_lea.vmem %s2628_s1, %s2355_s10 }
  0x67   : > { %s675_s21 = scalar_lea.vmem %s2629_s3, %s2355_s10 }
  0x68   : > { %v681_v0 = vld [vmem:[#allocation4] sm:$0xff]  ;;  %vm683_vm0 = vcmask 261120   ;;  %v682_v1 = vld [vmem:[#allocation4 + $0x8] sm:$0xff] }
  0x69   : > { %684 = vst.msk [vmem:[#allocation2] sm:$0xff] %vm683_vm0, %v681_v0 }
  0x6a   : > { %685 = vst.msk [vmem:[#allocation2 + $0x8] sm:$0xff] %vm683_vm0, %v682_v1 }
  0x6b PF: > { %v1774_v2 = vld [vmem:[%s645_s25 + $0x8] sm:$0xff]  ;;  %v1773_v3 = vld [vmem:[%s645_s25] sm:$0xff]  ;;  %vm709_vm1 = vcmask 261120   ;;  %s2630_s1 = scalar_lea.vmem [#allocation7], %s2339_s19  ;;  %s2117_s3 = smov 88   ;;  %vm738_vm2 = vcmask 64512  }
  0x6c   : > { %719 = vmatpush.bf16.msra.mxu0 %v1774_v2  ;;  %v1868_v7 = vld [vmem:[%s2630_s1] ss:$0 sm:$0xff]  ;;  %s2118_s0 = smov 96   ;;  %s2119_s16 = smov 120   ;;  %vm811_vm3 = vcmask 1043456   ;;  %vm977_vm4 = vcmask 130112  }
  0x6d   : > { %s2120_s12 = smov 80   ;;  %s2121_s25 = smov 112   ;;  %vm1100_vm5 = vcmask 195712   ;;  %vm1223_vm6 = vcmask 261312   ;;  %vm1408_vm14 = vcmask 523264  }
  0x6e   : > { %s2122_s17 = smov 72   ;;  %s2123_s18 = smov 104  }
  0x6f   : > { %s2124_s22 = smov 64   ;;  %s2125_s20 = smov 56  }
  0x70   : > { %v2399_v4 = vld [vmem:[#allocation2] sm:$0xff]  ;;  %720 = vmatpush.bf16.msra.mxu0 %v1773_v3  ;;  %s2126_s13 = smov 48   ;;  %s2127_s27 = smov 40  }
  0x71   : > { %v2401_v5 = vld [vmem:[#allocation2 + $0x8] sm:$0xff]  ;;  %s2128_s14 = smov 8   ;;  %s2129_s28 = smov 16  }
  0x72   : > { %v688_v6 = vpack.c.bf16 %v2401_v5, %v2399_v4  ;;  %s2130_s1 = smov 24   ;;  %p1764_p8 = scmp.ne.s32.totalorder %s2253_s30, 1 }
  0x74   : > { %1712 = vmatmul.msk.bf16.vlgmr.msra.gmra.mxu0 %vm709_vm1, %v688_v6 }
  0xf1   : > { %v722_v8 = vpop.f32.mrf.mxu0 }
  0xf2   : > { %v723_v9 = vadd.f32 %v1868_v7, %v722_v8 }
  0xf4   : > { %v727_v10 = vmul.f32 0.35355338, %v723_v9  ;;  %v731_v11 = vpack.c.bf16 %v723_v9, %v723_v9 }
  0xf6   : > { %v729_v12 = vpack.c.bf16 %v727_v10, %v727_v10  ;;  %v734_v13 = vunpack.c.l.b16 %v731_v11 }
  0xf8   : > { %v2408_v14 = vpack.c.b16 %v734_v13, %v734_v13  ;;  %v852_v15 = vunpack.c.l.b16 %v729_v12 }
  0xf9   : > { %v724_v16 = vpop.f32.mrf.mxu0 }
  0xfa   : > { %v725_v17 = vadd.f32 %v1868_v7, %v724_v16  ;;  %856 = vrot.lane.b32.xlu1 %v2408_v14, %s2117_s3  ;;  %736 = vrot.lane.b32.xlu0 %v2408_v14, %s2118_s0  ;;  %v853_v18 = vpack.c.b16 %v852_v15, %v852_v15 }
  0xfc   : > { %v728_v19 = vmul.f32 0.35355338, %v725_v17  ;;  %v732_v20 = vpack.c.bf16 %v725_v17, %v725_v17  ;;  %854 = vrot.lane.b32.xlu2 %v853_v18, %s2119_s16 }
  0xfe   : > { %v730_v21 = vpack.c.bf16 %v728_v19, %v728_v19  ;;  %v759_v22 = vunpack.c.l.b16 %v732_v20 }
 0x100   : > { %v2412_v23 = vpack.c.b16 %v759_v22, %v759_v22  ;;  %v878_v24 = vunpack.c.l.b16 %v730_v21 }
 0x102   : > { %882 = vrot.lane.b32.xlu1 %v2412_v23, %s2117_s3  ;;  %761 = vrot.lane.b32.xlu0 %v2412_v23, %s2118_s0  ;;  %v879_v25 = vpack.c.b16 %v878_v24, %v878_v24 }
 0x104   : > { %880 = vrot.lane.b32.xlu2 %v879_v25, %s2119_s16 }
 0x10a   : > { %1005 = vrot.lane.b32.xlu1 %v2412_v23, %s2120_s12  ;;  %982 = vrot.lane.b32.xlu0 %v2408_v14, %s2120_s12 }
 0x10c   : > { %980 = vrot.lane.b32.xlu2 %v853_v18, %s2121_s25 }
 0x112   : > { %1105 = vrot.lane.b32.xlu1 %v2408_v14, %s2122_s17  ;;  %1003 = vrot.lane.b32.xlu0 %v879_v25, %s2121_s25  ;;  %s2633_s25 = scalar_lea.vmem %s2600_s6, %s2355_s10 }
 0x114   : > { %1128 = vrot.lane.b32.xlu2 %v2412_v23, %s2122_s17 }
 0x11a   : > { %1126 = vrot.lane.b32.xlu1 %v879_v25, %s2123_s18  ;;  %1103 = vrot.lane.b32.xlu0 %v853_v18, %s2123_s18 }
 0x156   : > { %v855_v26 = vpop.permute.xlu2 %854 }
 0x15e   : > { %v881_v31 = vpop.permute.xlu2 %880 }
 0x166   : > { %v981_v36 = vpop.permute.xlu2 %980 }
 0x16c   : > { %v857_v27 = vpop.permute.xlu1 %856  ;;  %v737_v28 = vpop.permute.xlu0 %736 }
 0x16d   : > { %v743_v29 = vsel %vm738_vm2, %v737_v28, 0  ;;  %v862_v30 = vsel %vm738_vm2, %v857_v27, 0 }
 0x16e   : > { %752 = vmatpush.bf16.xpose.msra.mxu1 %v743_v29  ;;  %871 = vmatpush.bf16.xpose.msrb.mxu0 %v862_v30  ;;  %v1129_v41 = vpop.permute.xlu2 %1128 }
 0x16f   : > { %v1134_v43 = vsel %vm738_vm2, %v1129_v41, 0 }
 0x174   : > { %v883_v32 = vpop.permute.xlu1 %882  ;;  %v762_v33 = vpop.permute.xlu0 %761 }
 0x175   : > { %1713 = vmatmul.msk.bf16.vlgmr.msra.gmra.mxu1 %vm738_vm2, %v729_v12  ;;  %1717 = vmatmul.msk.bf16.vlgmr.msrb.gmra.mxu0 %vm738_vm2, %v855_v26  ;;  %v767_v34 = vsel %vm738_vm2, %v762_v33, 0  ;;  %v888_v35 = vsel %vm738_vm2, %v883_v32, 0 }
 0x176   : > { %776 = vmatpush.bf16.xpose.msra.mxu2 %v767_v34  ;;  %897 = vmatpush.bf16.xpose.msrb.mxu1 %v888_v35 }
 0x17c   : > { %v1006_v37 = vpop.permute.xlu1 %1005  ;;  %v983_v38 = vpop.permute.xlu0 %982 }
 0x17d   : > { %v1011_v39 = vsel %vm738_vm2, %v1006_v37, 0  ;;  %v988_v40 = vsel %vm738_vm2, %v983_v38, 0  ;;  %1714 = vmatmul.msk.bf16.vlgmr.msra.gmra.mxu2 %vm738_vm2, %v730_v21 }
 0x17e   : > { %997 = vmatpush.bf16.xpose.msra.mxu0 %v988_v40  ;;  %1020 = vmatpush.bf16.xpose.msra.mxu1 %v1011_v39 }
 0x184   : > { %v1106_v42 = vpop.permute.xlu1 %1105  ;;  %v1004_v45 = vpop.permute.xlu0 %1003 }
 0x185   : > { %v1111_v44 = vsel %vm738_vm2, %v1106_v42, 0  ;;  %1718 = vmatmul.msk.bf16.vlgmr.msrb.gmra.mxu1 %vm738_vm2, %v881_v31  ;;  %1721 = vmatmul.msk.bf16.vlgmr.msra.gmra.mxu0 %vm738_vm2, %v981_v36 }
 0x186   : > { %1143 = vmatpush.bf16.xpose.msrb.mxu1 %v1134_v43  ;;  %1120 = vmatpush.bf16.xpose.msrb.mxu0 %v1111_v44 }
 0x18c   : > { %v1104_v46 = vpop.permute.xlu0 %1103  ;;  %v1127_v47 = vpop.permute.xlu1 %1126 }
 0x195   : > { %1722 = vmatmul.msk.bf16.vlgmr.msra.gmra.mxu1 %vm738_vm2, %v1004_v45  ;;  %1725 = vmatmul.msk.bf16.vlgmr.msrb.gmra.mxu0 %vm738_vm2, %v1104_v46 }
 0x1a5   : > { %1726 = vmatmul.msk.bf16.vlgmr.msrb.gmra.mxu1 %vm738_vm2, %v1127_v47 }
 0x1f2   : > { %v754_v48 = vpop.f32.mrf.mxu1  ;;  %v873_v49 = vpop.f32.mrf.mxu0 }
 0x1f3   : > { %v903_v50 = vsel %vm738_vm2, %v873_v49, -inf  ;;  %v782_v51 = vsel %vm738_vm2, %v754_v48, -inf }
 0x1f4   : > { %904 = vmax.xlane.f32.xlu1 %v903_v50  ;;  %783 = vmax.xlane.f32.xlu2 %v782_v51 }
 0x1fa   : > { %v756_v52 = vpop.f32.mrf.mxu1  ;;  %v875_v53 = vpop.f32.mrf.mxu0 }
 0x200   : > { %v778_v54 = vpop.f32.mrf.mxu2 }
 0x201   : > { %v785_v55 = vsel %vm738_vm2, %v778_v54, -inf }
 0x202   : > { %786 = vmax.xlane.f32.xlu0 %v785_v55  ;;  %v899_v56 = vpop.f32.mrf.mxu1  ;;  %v2439_v57 = vpop.f32.mrf.mxu0 }
 0x203   : > { %v906_v58 = vsel %vm738_vm2, %v899_v56, -inf  ;;  %v1026_v8 = vsel %vm738_vm2, %v2439_v57, -inf }
 0x204   : > { %907 = vmax.xlane.f32.xlu2 %v906_v58 }
 0x208   : > { %v780_v59 = vpop.f32.mrf.mxu2 }
 0x20a   : > { %v901_v60 = vpop.f32.mrf.mxu1  ;;  %v1001_v61 = vpop.f32.mrf.mxu0 }
 0x20d   : > { %828 = vrot.lane.b32.xlu1 %v2412_v23, %s2124_s22 }
 0x212   : > { %v2443_v62 = vpop.f32.mrf.mxu1  ;;  %v2445_v63 = vpop.f32.mrf.mxu0 }
 0x213   : > { %v1029_v7 = vsel %vm738_vm2, %v2443_v62, -inf  ;;  %v1149_v9 = vsel %vm738_vm2, %v2445_v63, -inf }
 0x215   : > { %948 = vrot.lane.b32.xlu1 %v2412_v23, %s2125_s20 }
 0x216   : > { %927 = vrot.lane.b32.xlu0 %v2408_v14, %s2125_s20 }
 0x21a   : > { %v1024_v0 = vpop.f32.mrf.mxu1  ;;  %v1124_v1 = vpop.f32.mrf.mxu0 }
 0x21c   : > { %806 = vrot.lane.b32.xlu2 %v2408_v14, %s2124_s22 }
 0x222   : > { %v1145_v2 = vpop.f32.mrf.mxu1 }
 0x223   : > { %v1152_v6 = vsel %vm738_vm2, %v1145_v2, -inf }
 0x22a   : > { %v1147_v3 = vpop.f32.mrf.mxu1 }
 0x23f   : > { %1153 = vmax.xlane.f32.xlu1 %v1152_v6 }
 0x240   : > { %1030 = vmax.xlane.f32.xlu0 %v1029_v7 }
 0x245   : > { %1027 = vmax.xlane.f32.xlu2 %v1026_v8 }
 0x248   : > { %1150 = vmax.xlane.f32.xlu0 %v1149_v9 }
 0x267   : > { %v905_v10 = vpop.xlane.xlu1 %904  ;;  %v784_v11 = vpop.xlane.xlu2 %783 }
 0x268   : > { %v909_v12 = vsub.f32 %v873_v49, %v905_v10  ;;  %v788_v13 = vsub.f32 %v754_v48, %v784_v11 }
 0x26a   : > { %v911_v15 = vmul.f32 1.442695, %v909_v12  ;;  %v790_v16 = vmul.f32 1.442695, %v788_v13 }
 0x26c   : > { %1876 = vpow2.f32 %v911_v15 }
 0x26d   : > { %1878 = vpow2.f32 %v790_v16 }
 0x272   : > { %v2457_v17 = vpop.eup %1876 }
 0x273   : > { %v2459_v18 = vpop.eup %1878  ;;  %v915_v19 = vsel %vm738_vm2, %v2457_v17, 0.0 }
 0x274   : > { %916 = vadd.xlane.f32.xlu0 %v915_v19  ;;  %v794_v20 = vsel %vm738_vm2, %v2459_v18, 0.0 }
 0x275   : > { %795 = vadd.xlane.f32.xlu1 %v794_v20  ;;  %v787_v21 = vpop.xlane.xlu0 %786 }
 0x276   : > { %v789_v22 = vsub.f32 %v778_v54, %v787_v21 }
 0x277   : > { %v908_v24 = vpop.xlane.xlu2 %907 }
 0x278   : > { %v792_v25 = vmul.f32 1.442695, %v789_v22  ;;  %v910_v26 = vsub.f32 %v899_v56, %v908_v24 }
 0x27a   : > { %1880 = vpow2.f32 %v792_v25  ;;  %v913_v27 = vmul.f32 1.442695, %v910_v26 }
 0x27c   : > { %1882 = vpow2.f32 %v913_v27 }
 0x27f   : > { %v829_v28 = vpop.permute.xlu1 %828  ;;  %v807_v29 = vpop.permute.xlu2 %806 }
 0x280   : > { %v2465_v30 = vpop.eup %1880  ;;  %v813_v31 = vsel %vm811_vm3, %v807_v29, 0  ;;  %v834_v32 = vsel %vm811_vm3, %v829_v28, 0 }
 0x281   : > { %822 = vmatpush.bf16.msra.mxu3 %v813_v31  ;;  %v797_v33 = vsel %vm738_vm2, %v2465_v30, 0.0 }
 0x282   : > { %v2471_v34 = vpop.eup %1882  ;;  %798 = vadd.xlane.f32.xlu0 %v797_v33 }
 0x283   : > { %v918_v35 = vsel %vm738_vm2, %v2471_v34, 0.0 }
 0x284   : > { %919 = vadd.xlane.f32.xlu2 %v918_v35 }
 0x285   : > { %843 = vmatpush.bf16.msrb.mxu3 %v834_v32 }
 0x287   : > { %v949_v38 = vpop.permute.xlu1 %948 }
 0x288   : > { %v928_v36 = vpop.permute.xlu0 %927  ;;  %v954_v3 = vsel %vm811_vm3, %v949_v38, 0 }
 0x289   : > { %v933_v37 = vsel %vm811_vm3, %v928_v36, 0 }
 0x28a   : > { %942 = vmatpush.bf16.msrb.mxu2 %v933_v37 }
 0x28e   : > { %1071 = vrot.lane.b32.xlu1 %v2412_v23, %s2126_s13 }
 0x29c   : > { %1050 = vrot.lane.b32.xlu2 %v2408_v14, %s2126_s13 }
 0x2b2   : > { %v1154_v39 = vpop.xlane.xlu1 %1153 }
 0x2b3   : > { %v1156_v40 = vsub.f32 %v1145_v2, %v1154_v39  ;;  %v1031_v41 = vpop.xlane.xlu0 %1030 }
 0x2b4   : > { %v1033_v42 = vsub.f32 %v2443_v62, %v1031_v41 }
 0x2b5   : > { %v1159_v44 = vmul.f32 1.442695, %v1156_v40 }
 0x2b6   : > { %v1036_v43 = vmul.f32 1.442695, %v1033_v42 }
 0x2b8   : > { %1884 = vpow2.f32 %v1036_v43  ;;  %v1028_v45 = vpop.xlane.xlu2 %1027 }
 0x2b9   : > { %v1032_v46 = vsub.f32 %v2439_v57, %v1028_v45  ;;  %1886 = vpow2.f32 %v1159_v44 }
 0x2bb   : > { %v1034_v47 = vmul.f32 1.442695, %v1032_v46  ;;  %v1151_v48 = vpop.xlane.xlu0 %1150 }
 0x2bc   : > { %v1155_v49 = vsub.f32 %v2445_v63, %v1151_v48 }
 0x2bd   : > { %1888 = vpow2.f32 %v1034_v47 }
 0x2be   : > { %v1885_v50 = vpop.eup %1884  ;;  %v1157_v51 = vmul.f32 1.442695, %v1155_v49 }
 0x2bf   : > { %v1041_v52 = vsel %vm738_vm2, %v1885_v50, 0.0  ;;  %v2482_v53 = vpop.eup %1886 }
 0x2c0   : > { %1890 = vpow2.f32 %v1157_v51  ;;  %1042 = vadd.xlane.f32.xlu0 %v1041_v52  ;;  %v1164_v56 = vsel %vm738_vm2, %v2482_v53, 0.0 }
 0x2c3   : > { %v1889_v54 = vpop.eup %1888 }
 0x2c4   : > { %v1038_v55 = vsel %vm738_vm2, %v1889_v54, 0.0 }
 0x2c5   : > { %1039 = vadd.xlane.f32.xlu1 %v1038_v55  ;;  %1165 = vadd.xlane.f32.xlu2 %v1164_v56  ;;  %v1776_v56 = vld [vmem:[%s2368_s29 + $0x8] sm:$0xff] }
 0x2c6   : > { %v1891_v57 = vpop.eup %1890  ;;  %1258 = vmatpush.bf16.msra.mxu0 %v1776_v56 }
 0x2c7   : > { %v1161_v58 = vsel %vm738_vm2, %v1891_v57, 0.0 }
 0x2c8   : > { %1162 = vadd.xlane.f32.xlu0 %v1161_v58 }
 0x2dc   : > { %1173 = vrot.lane.b32.xlu0 %v2408_v14, %s2127_s27 }
 0x2de   : > { %1194 = vrot.lane.b32.xlu1 %v2412_v23, %s2127_s27 }
 0x2e7   : > { %v917_v59 = vpop.xlane.xlu0 %916 }
 0x2e8   : > { %1892 = vrcp.f32 %v917_v59  ;;  %v796_v60 = vpop.xlane.xlu1 %795 }
 0x2e9   : > { %1894 = vrcp.f32 %v796_v60 }
 0x2ee   : > { %v1893_v61 = vpop.eup %1892 }
 0x2ef   : > { %v1895_v62 = vpop.eup %1894  ;;  %v923_v63 = vmul.f32 %v1893_v61, %v2457_v17 }
 0x2f0   : > { %v802_v0 = vmul.f32 %v1895_v62, %v2459_v18 }
 0x2f1   : > { %v925_v1 = vpack.c.bf16 %v923_v63, %v923_v63 }
 0x2f2   : > { %v804_v2 = vpack.c.bf16 %v802_v0, %v802_v0 }
 0x2f3   : > { %1719 = vmatmul.msk.bf16.vlgmr.msrb.gmra.mxu2 %vm738_vm2, %v925_v1 }
 0x2f4   : > { %1715 = vmatmul.msk.bf16.vlgmr.msra.gmra.mxu3 %vm738_vm2, %v804_v2 }
 0x2f5   : > { %963 = vmatpush.bf16.msra.mxu3 %v954_v3  ;;  %v799_v14 = vpop.xlane.xlu0 %798 }
 0x2f6   : > { %1896 = vrcp.f32 %v799_v14 }
 0x2f7   : > { %v920_v23 = vpop.xlane.xlu2 %919 }
 0x2f8   : > { %1898 = vrcp.f32 %v920_v23 }
 0x2fc   : > { %v1897_v6 = vpop.eup %1896 }
 0x2fd   : > { %v803_v7 = vmul.f32 %v1897_v6, %v2465_v30 }
 0x2fe   : > { %v1899_v13 = vpop.eup %1898 }
 0x2ff   : > { %v1051_v8 = vpop.permute.xlu2 %1050  ;;  %v805_v11 = vpack.c.bf16 %v803_v7, %v803_v7  ;;  %v924_v15 = vmul.f32 %v1899_v13, %v2471_v34 }
 0x300   : > { %v1056_v9 = vsel %vm811_vm3, %v1051_v8, 0  ;;  %v1072_v10 = vpop.permute.xlu1 %1071 }
 0x301   : > { %1065 = vmatpush.bf16.msra.mxu2 %v1056_v9  ;;  %v1077_v12 = vsel %vm811_vm3, %v1072_v10, 0  ;;  %v926_v16 = vpack.c.bf16 %v924_v15, %v924_v15  ;;  %v2131_v10 = vmov 32.0  }
 0x304   : > { %1716 = vmatmul.msk.bf16.vlgmr.msrb.gmra.mxu3 %vm738_vm2, %v805_v11 }
 0x305   : > { %1086 = vmatpush.bf16.msrb.mxu3 %v1077_v12 }
 0x314   : > { %1720 = vmatmul.msk.bf16.vlgmr.msra.gmra.mxu3 %vm738_vm2, %v926_v16 }
 0x333   : > { %v1043_v17 = vpop.xlane.xlu0 %1042 }
 0x334   : > { %1900 = vrcp.f32 %v1043_v17 }
 0x338   : > { %v1040_v18 = vpop.xlane.xlu1 %1039  ;;  %v1166_v25 = vpop.xlane.xlu2 %1165 }
 0x339   : > { %1902 = vrcp.f32 %v1040_v18 }
 0x33a   : > { %v1901_v19 = vpop.eup %1900  ;;  %1904 = vrcp.f32 %v1166_v25 }
 0x33b   : > { %v1047_v20 = vmul.f32 %v1901_v19, %v1885_v50  ;;  %v1163_v27 = vpop.xlane.xlu0 %1162 }
 0x33c   : > { %1906 = vrcp.f32 %v1163_v27 }
 0x33d   : > { %v1049_v21 = vpack.c.bf16 %v1047_v20, %v1047_v20  ;;  %1908 = vrcp.f32 %v2131_v10 }
 0x33f   : > { %1724 = vmatmul.msk.bf16.vlgmr.msrb.gmra.mxu3 %vm738_vm2, %v1049_v21  ;;  %v1903_v22 = vpop.eup %1902 }
 0x340   : > { %v1046_v24 = vmul.f32 %v1903_v22, %v1889_v54  ;;  %v1905_v28 = vpop.eup %1904 }
 0x341   : > { %v1170_v31 = vmul.f32 %v1905_v28, %v2482_v53  ;;  %v1778_v28 = vld [vmem:[%s2377_s2 + $0x8] sm:$0xff] }
 0x342   : > { %v1048_v26 = vpack.c.bf16 %v1046_v24, %v1046_v24  ;;  %v1907_v29 = vpop.eup %1906  ;;  %1361 = vmatpush.bf16.msra.mxu1 %v1778_v28 }
 0x343   : > { %v1169_v32 = vmul.f32 %v1907_v29, %v1891_v57  ;;  %v1172_v36 = vpack.c.bf16 %v1170_v31, %v1170_v31  ;;  %v1775_v57 = vld [vmem:[%s2368_s29] sm:$0xff]  ;;  %s2631_s29 = scalar_lea.vmem %s2598_s4, %s2355_s10  ;;  %v1909_v11 = vpop.eup %1908 }
 0x344   : > { %1723 = vmatmul.msk.bf16.vlgmr.msra.gmra.mxu2 %vm738_vm2, %v1048_v26  ;;  %1259 = vmatpush.bf16.msra.mxu0 %v1775_v57  ;;  %v1869_v1 = vld [vmem:[%s2631_s29] ss:$0 sm:$0xff]  ;;  %v1277_v12 = vmul.f32 32.0, %v1909_v11  ;;  %vm1281_vm7 = vweird.f32 %v1909_v11 }
 0x345   : > { %v1171_v37 = vpack.c.bf16 %v1169_v32, %v1169_v32  ;;  %v1777_v31 = vld [vmem:[%s2377_s2] sm:$0xff]  ;;  %s2632_s2 = scalar_lea.vmem [#allocation9], %s2339_s19 }
 0x346   : > { %v1278_v13 = vsub.f32 1.0, %v1277_v12  ;;  %1362 = vmatpush.bf16.msra.mxu1 %v1777_v31 }
 0x348   : > { %v1279_v15 = vmul.f32 %v1909_v11, %v1278_v13 }
 0x34a   : > { %v1280_v16 = vadd.f32 %v1909_v11, %v1279_v15 }
 0x34e   : > { %v1174_v30 = vpop.permute.xlu0 %1173 }
 0x34f   : > { %v1179_v33 = vsel %vm811_vm3, %v1174_v30, 0 }
 0x350   : > { %1188 = vmatpush.bf16.msrb.mxu2 %v1179_v33  ;;  %v1195_v34 = vpop.permute.xlu1 %1194 }
 0x351   : > { %v1200_v35 = vsel %vm811_vm3, %v1195_v34, 0 }
 0x352   : > { %1209 = vmatpush.bf16.msra.mxu3 %v1200_v35 }
 0x354   : > { %1727 = vmatmul.msk.bf16.vlgmr.msrb.gmra.mxu2 %vm738_vm2, %v1171_v37 }
 0x355   : > { %1728 = vmatmul.msk.bf16.vlgmr.msra.gmra.mxu3 %vm738_vm2, %v1172_v36 }
 0x376   : > { %v944_v38 = vpop.f32.mrf.mxu2 }
 0x377   : > { %v824_v39 = vpop.f32.mrf.mxu3  ;;  %971 = vrot.lane.b32.xlu0 %v944_v38, %s2128_s14 }
 0x378   : > { %849 = vst.msk [vmem:[#allocation3] sm:$0xff] %vm738_vm2, %v824_v39 }
 0x37e   : > { %v946_v40 = vpop.f32.mrf.mxu2 }
 0x37f   : > { %v826_v41 = vpop.f32.mrf.mxu3 }
 0x387   : > { %v845_v42 = vpop.f32.mrf.mxu3 }
 0x388   : > { %850 = vst.msk [vmem:[#allocation3 + $0x8] sm:$0xff] %vm738_vm2, %v845_v42 }
 0x38f   : > { %v847_v43 = vpop.f32.mrf.mxu3 }
 0x397   : > { %v965_v44 = vpop.f32.mrf.mxu3 }
 0x398   : > { %973 = vrot.lane.b32.xlu1 %v965_v44, %s2128_s14 }
 0x39f   : > { %v967_v45 = vpop.f32.mrf.mxu3 }
 0x3c2   : > { %v1088_v46 = vpop.f32.mrf.mxu3 }
 0x3c3   : > { %1096 = vrot.lane.b32.xlu1 %v1088_v46, %s2129_s28 }
 0x3c7   : > { %v1067_v47 = vpop.f32.mrf.mxu2 }
 0x3c8   : > { %1094 = vrot.lane.b32.xlu0 %v1067_v47, %s2129_s28  ;;  %v1870_v47 = vld [vmem:[%s2632_s2] ss:$0 sm:$0xff] }
 0x3ca   : > { %v1090_v48 = vpop.f32.mrf.mxu3 }
 0x3cf   : > { %v1069_v49 = vpop.f32.mrf.mxu2 }
 0x3d7   : > { %v1190_v50 = vpop.f32.mrf.mxu2 }
 0x3d8   : > { %v1211_v51 = vpop.f32.mrf.mxu3  ;;  %1217 = vrot.lane.b32.xlu2 %v1190_v50, %s2130_s1 }
 0x3d9   : > { %1219 = vrot.lane.b32.xlu0 %v1211_v51, %s2130_s1  ;;  %v1871_v51 = vld [vmem:[%s2633_s25] ss:$0 sm:$0xff] }
 0x3df   : > { %v1192_v52 = vpop.f32.mrf.mxu2 }
 0x3e0   : > { %v1213_v53 = vpop.f32.mrf.mxu3 }
 0x3e9   : > { %v972_v54 = vpop.permute.xlu0 %971 }
 0x3ea   : > { %978 = vst.msk [vmem:[#allocation3] sm:$0xff] %vm977_vm4, %v972_v54 }
 0x40a   : > { %v974_v55 = vpop.permute.xlu1 %973 }
 0x40b   : > { %979 = vst.msk [vmem:[#allocation3 + $0x8] sm:$0xff] %vm977_vm4, %v974_v55 }
 0x432   : > { %v1218_v60 = vpop.permute.xlu2 %1217 }
 0x435   : > { %v1097_v58 = vpop.permute.xlu1 %1096 }
 0x436   : > { %1102 = vst.msk [vmem:[#allocation3 + $0x8] sm:$0xff] %vm1100_vm5, %v1097_v58  ;;  %v1782_v58 = vld [vmem:[%s2387_s23 + $0x18] sm:$0xff] }
 0x437   : > { %1416 = vmatpush.bf16.msra.mxu2 %v1782_v58 }
 0x43a   : > { %v1095_v59 = vpop.permute.xlu0 %1094 }
 0x43b   : > { %1101 = vst.msk [vmem:[#allocation3] sm:$0xff] %vm1100_vm5, %v1095_v59  ;;  %v1781_v59 = vld [vmem:[%s2387_s23 + $0x10] sm:$0xff] }
 0x43c   : > { %1224 = vst.msk [vmem:[#allocation3] sm:$0xff] %vm1223_vm6, %v1218_v60  ;;  %1417 = vmatpush.bf16.msra.mxu2 %v1781_v59  ;;  %v1780_v60 = vld [vmem:[%s2387_s23 + $0x8] sm:$0xff] }
 0x440   : > { %1418 = vmatpush.bf16.msra.mxu2 %v1780_v60 }
 0x443   : > { %v1226_v62 = vld [vmem:[#allocation3] sm:$0xff] }
 0x44b   : > { %v1220_v61 = vpop.permute.xlu0 %1219 }
 0x44c   : > { %1225 = vst.msk [vmem:[#allocation3 + $0x8] sm:$0xff] %vm1223_vm6, %v1220_v61  ;;  %v1779_v61 = vld [vmem:[%s2387_s23] sm:$0xff] }
 0x44d   : > { %1419 = vmatpush.bf16.msra.mxu2 %v1779_v61 }
 0x453   : > { %v1227_v63 = vld [vmem:[#allocation3 + $0x8] sm:$0xff] }
 0x454   : > { %v1228_v0 = vpack.c.bf16 %v1227_v63, %v1226_v62  ;;  %v1872_v63 = vld [vmem:[%s664_s24] ss:$0 sm:$0xff]  ;;  %s2635_s24 = scalar_lea.vmem [#allocation10], %s2339_s19 }
 0x456   : > { %1737 = vmatmul.msk.bf16.vlgmr.msra.gmra.mxu0 %vm709_vm1, %v1228_v0 }
 0x4d3   : > { %v1261_v2 = vpop.f32.mrf.mxu0 }
 0x4d4   : > { %v1262_v3 = vadd.f32 %v1869_v1, %v1261_v2 }
 0x4d6   : > { %v1266_v14 = vadd.f32 %v1262_v3, %v2399_v4  ;;  %v2524_v4 = vsel %vm1281_vm7, %v1909_v11, %v1280_v16 }
 0x4d8   : > { %v1270_v23 = vsel %vm709_vm1, %v1266_v14, 0.0 }
 0x4d9   : > { %1271 = vadd.xlane.f32.xlu1 %v1270_v23 }
 0x4db   : > { %v1263_v6 = vpop.f32.mrf.mxu0 }
 0x4dc   : > { %v1264_v7 = vadd.f32 %v1869_v1, %v1263_v6  ;;  %v1873_v6 = vld [vmem:[%s672_s15] ss:$0 sm:$0xff] }
 0x4de   : > { %v1267_v8 = vadd.f32 %v1264_v7, %v2401_v5 }
 0x4e0   : > { %v1273_v9 = vsel %vm709_vm1, %v1267_v8, 0.0 }
 0x4e1   : > { %1274 = vadd.xlane.f32.xlu0 %v1273_v9 }
 0x54c   : > { %v1272_v17 = vpop.xlane.xlu1 %1271 }
 0x54d   : > { %v1283_v18 = vmul.f32 %v2524_v4, %v1272_v17 }
 0x54f   : > { %v1285_v19 = vsub.f32 %v1266_v14, %v1283_v18 }
 0x551   : > { %v1287_v5 = vmul.f32 %v1285_v19, %v1285_v19 }
 0x553   : > { %v1289_v20 = vsel %vm709_vm1, %v1287_v5, 0.0 }
 0x554   : > { %v1275_v21 = vpop.xlane.xlu0 %1274  ;;  %1290 = vadd.xlane.f32.xlu2 %v1289_v20 }
 0x555   : > { %v1284_v22 = vmul.f32 %v2524_v4, %v1275_v21 }
 0x557   : > { %v1286_v24 = vsub.f32 %v1267_v8, %v1284_v22 }
 0x559   : > { %v1288_v25 = vmul.f32 %v1286_v24, %v1286_v24 }
 0x55b   : > { %v1292_v26 = vsel %vm709_vm1, %v1288_v25, 0.0 }
 0x55c   : > { %1293 = vadd.xlane.f32.xlu1 %v1292_v26 }
 0x5c7   : > { %v1291_v27 = vpop.xlane.xlu2 %1290 }
 0x5c8   : > { %v1295_v29 = vmul.f32 %v1291_v27, %v2524_v4 }
 0x5ca   : > { %v1297_v30 = vadd.f32 1e-05, %v1295_v29 }
 0x5cc   : > { %1910 = vrsqrt.f32 %v1297_v30  ;;  %vm1305_vm9 = vweird.f32 %v1297_v30 }
 0x5cf   : > { %v1294_v32 = vpop.xlane.xlu1 %1293 }
 0x5d0   : > { %v1296_v33 = vmul.f32 %v1294_v32, %v2524_v4 }
 0x5d2   : > { %v1911_v34 = vpop.eup %1910  ;;  %v1298_v35 = vadd.f32 1e-05, %v1296_v33 }
 0x5d3   : > { %v1300_v36 = vmul.f32 %v1911_v34, %v1297_v30  ;;  %vm1306_vm8 = vweird.f32 %v1911_v34 }
 0x5d4   : > { %1912 = vrsqrt.f32 %v1298_v35  ;;  %vm1307_vm10 = vmor %vm1305_vm9, %vm1306_vm8  ;;  %vm1315_vm12 = vweird.f32 %v1298_v35 }
 0x5d5   : > { %v1301_v37 = vmul.f32 %v1911_v34, %v1300_v36 }
 0x5d7   : > { %v1302_v38 = vmul.f32 0.5, %v1301_v37 }
 0x5d9   : > { %v1303_v39 = vsub.f32 1.5, %v1302_v38 }
 0x5da   : > { %v1913_v40 = vpop.eup %1912 }
 0x5db   : > { %v1304_v41 = vmul.f32 %v1911_v34, %v1303_v39  ;;  %v1310_v42 = vmul.f32 %v1913_v40, %v1298_v35  ;;  %vm1316_vm11 = vweird.f32 %v1913_v40 }
 0x5dc   : > { %vm1317_vm13 = vmor %vm1315_vm12, %vm1316_vm11 }
 0x5dd   : > { %v1311_v43 = vmul.f32 %v1913_v40, %v1310_v42  ;;  %v1308_v44 = vsel %vm1307_vm10, %v1911_v34, %v1304_v41 }
 0x5de   : > { %v1319_v48 = vmul.f32 %v1308_v44, %v1285_v19 }
 0x5df   : > { %v1312_v45 = vmul.f32 0.5, %v1311_v43 }
 0x5e0   : > { %v1324_v52 = vmul.f32 %v1870_v47, %v1319_v48 }
 0x5e1   : > { %v1313_v46 = vsub.f32 1.5, %v1312_v45 }
 0x5e2   : > { %v1329_v55 = vadd.f32 %v1871_v51, %v1324_v52 }
 0x5e3   : > { %v1314_v49 = vmul.f32 %v1913_v40, %v1313_v46 }
 0x5e5   : > { %v1318_v50 = vsel %vm1317_vm13, %v1913_v40, %v1314_v49  ;;  %v1874_v40 = vld [vmem:[%s2635_s24] ss:$0 sm:$0xff] }
 0x5e6   : > { %v1320_v53 = vmul.f32 %v1318_v50, %v1286_v24 }
 0x5e8   : > { %v1325_v54 = vmul.f32 %v1870_v47, %v1320_v53 }
 0x5ea   : > { %v1330_v56 = vadd.f32 %v1871_v51, %v1325_v54 }
 0x5ec   : > { %v1331_v57 = vpack.c.bf16 %v1330_v56, %v1329_v55 }
 0x5ee   : > { %1746 = vmatmul.msk.bf16.vlgmr.msra.gmra.mxu1 %vm709_vm1, %v1331_v57 }
 0x66b   : > { %v1364_v62 = vpop.f32.mrf.mxu1 }
 0x66c   : > { %v1365_v0 = vadd.f32 %v1872_v63, %v1364_v62 }
 0x66e   : > { %v1369_v3 = vmax.f32 %v1365_v0, 0.0 }
 0x673   : > { %v1366_v1 = vpop.f32.mrf.mxu1 }
 0x674   : > { %v1367_v2 = vadd.f32 %v1872_v63, %v1366_v1 }
 0x676   : > { %v1370_v14 = vmax.f32 %v1367_v2, 0.0 }
 0x678   : > { %v1371_v23 = vpack.c.bf16 %v1370_v14, %v1369_v3 }
 0x67a   : > { %1763 = vmatmul.msk.bf16.vlgmr.msra.gmra.mxu2 %vm1408_vm14, %v1371_v23 }
 0x6fd   : > { %v1421_v7 = vpop.f32.mrf.mxu2 }
 0x6fe   : > { %v1422_v8 = vadd.f32 %v1873_v6, %v1421_v7 }
 0x700   : > { %v1426_v9 = vadd.f32 %v1422_v8, %v1329_v55 }
 0x702   : > { %v1430_v10 = vsel %vm709_vm1, %v1426_v9, 0.0 }
 0x703   : > { %1431 = vadd.xlane.f32.xlu0 %v1430_v10 }
 0x705   : > { %v1423_v11 = vpop.f32.mrf.mxu2 }
 0x706   : > { %v1424_v12 = vadd.f32 %v1873_v6, %v1423_v11 }
 0x708   : > { %v1427_v13 = vadd.f32 %v1424_v12, %v1330_v56 }
 0x70a   : > { %v1433_v15 = vsel %vm709_vm1, %v1427_v13, 0.0 }
 0x70b   : > { %1434 = vadd.xlane.f32.xlu1 %v1433_v15 }
 0x776   : > { %v1432_v16 = vpop.xlane.xlu0 %1431 }
 0x777   : > { %v1436_v17 = vmul.f32 %v1432_v16, %v2524_v4 }
 0x779   : > { %v1438_v18 = vsub.f32 %v1426_v9, %v1436_v17 }
 0x77b   : > { %v1440_v19 = vmul.f32 %v1438_v18, %v1438_v18 }
 0x77d   : > { %v1442_v5 = vsel %vm709_vm1, %v1440_v19, 0.0 }
 0x77e   : > { %v1435_v20 = vpop.xlane.xlu1 %1434  ;;  %1443 = vadd.xlane.f32.xlu0 %v1442_v5 }
 0x77f   : > { %v1437_v21 = vmul.f32 %v1435_v20, %v2524_v4 }
 0x781   : > { %v1439_v22 = vsub.f32 %v1427_v13, %v1437_v21 }
 0x783   : > { %v1441_v24 = vmul.f32 %v1439_v22, %v1439_v22 }
 0x785   : > { %v1445_v25 = vsel %vm709_vm1, %v1441_v24, 0.0 }
 0x786   : > { %1446 = vadd.xlane.f32.xlu1 %v1445_v25 }
 0x7f1   : > { %v1444_v26 = vpop.xlane.xlu0 %1443 }
 0x7f2   : > { %v1448_v27 = vmul.f32 %v1444_v26, %v2524_v4 }
 0x7f4   : > { %v1450_v28 = vadd.f32 1e-05, %v1448_v27 }
 0x7f6   : > { %1914 = vrsqrt.f32 %v1450_v28  ;;  %vm1458_vm0 = vweird.f32 %v1450_v28 }
 0x7f9   : > { %v1447_v29 = vpop.xlane.xlu1 %1446 }
 0x7fa   : > { %v1449_v30 = vmul.f32 %v1447_v29, %v2524_v4  ;;  %v1875_v4 = vld [vmem:[%s675_s21] ss:$0 sm:$0xff] }
 0x7fc   : > { %v1915_v31 = vpop.eup %1914  ;;  %v1451_v32 = vadd.f32 1e-05, %v1449_v30 }
 0x7fd   : > { %v1453_v33 = vmul.f32 %v1915_v31, %v1450_v28  ;;  %vm1459_vm15 = vweird.f32 %v1915_v31 }
 0x7fe   : > { %1916 = vrsqrt.f32 %v1451_v32  ;;  %vm1460_vm2 = vmor %vm1458_vm0, %vm1459_vm15  ;;  %vm1468_vm4 = vweird.f32 %v1451_v32 }
 0x7ff   : > { %v1454_v34 = vmul.f32 %v1915_v31, %v1453_v33 }
 0x801   : > { %v1455_v35 = vmul.f32 0.5, %v1454_v34 }
 0x803   : > { %v1456_v36 = vsub.f32 1.5, %v1455_v35 }
 0x804   : > { %v1917_v37 = vpop.eup %1916 }
 0x805   : > { %v1457_v38 = vmul.f32 %v1915_v31, %v1456_v36  ;;  %v1463_v39 = vmul.f32 %v1917_v37, %v1451_v32  ;;  %vm1469_vm3 = vweird.f32 %v1917_v37 }
 0x806   : > { %vm1470_vm5 = vmor %vm1468_vm4, %vm1469_vm3 }
 0x807   : > { %v1461_v41 = vsel %vm1460_vm2, %v1915_v31, %v1457_v38  ;;  %v1464_v42 = vmul.f32 %v1917_v37, %v1463_v39 }
 0x808   : > { %v1472_v43 = vmul.f32 %v1461_v41, %v1438_v18 }
 0x809   : > { %v1465_v44 = vmul.f32 0.5, %v1464_v42 }
 0x80a   : > { %v1477_v45 = vmul.f32 %v1874_v40, %v1472_v43 }
 0x80b   : > { %v1466_v46 = vsub.f32 1.5, %v1465_v44 }
 0x80c   : > { %v1482_v47 = vadd.f32 %v1875_v4, %v1477_v45 }
 0x80d   : > { %v1467_v48 = vmul.f32 %v1917_v37, %v1466_v46 }
 0x80e   : > { %1484 = vst.msk [vmem:[#allocation2] sm:$0xff] %vm709_vm1, %v1482_v47 }
 0x80f   : > { %v1471_v49 = vsel %vm1470_vm5, %v1917_v37, %v1467_v48 }
 0x810   : > { %v1473_v50 = vmul.f32 %v1471_v49, %v1439_v22 }
 0x812   : > { %v1478_v51 = vmul.f32 %v1874_v40, %v1473_v50  ;;  %1489 = sbr.rel (%p1764_p8) target bundleno = 2073 (0x819), region = 96 }
 0x814   : > { %v1483_v52 = vadd.f32 %v1875_v4, %v1478_v51 }
 0x816   : > { %1485 = vst.msk [vmem:[#allocation2 + $0x8] sm:$0xff] %vm709_vm1, %v1483_v52 }
 0x817   : > { %1490 = vst.msk [vmem:[#allocation12] sm:$0xff] %vm709_vm1, %v1482_v47 }
 0x818   : > { %1491 = vst.msk [vmem:[#allocation12 + $0x8] sm:$0xff] %vm709_vm1, %v1483_v52 }
 0x819 PF: > { %p1814_p10 = scmp.eq.s32.totalorder %s2253_s30, 1  ;;  %s2132_s19 = smov [#allocation12]  }
 0x81a   : > { %s1497_s10 = sshll.u32 %s2132_s19, 4  ;;  %s2637_s1 = sld [smem:[#allocation26_spill]]  ;;  %s1498_s10 = int_to_ptr.vmem [resolvable:$true] %s1497_s10 }
 0x81b   : > { %s2133_s0 = smov 128  }
 0x820   : > { %s1499_s3 = sshll.u32 %s2637_s1, 4  ;;  %s1500_s3 = int_to_ptr.hbm [resolvable:$true] %s1499_s3 }
 0x821   : > { %1794 = dma.vmem_to_hbm [thread:$0]  (%p1814_p10), %s1498_s10, 256, %s1500_s3, [#allocation6], %s2133_s0, %s2133_s0, %s2128_s14  }
 0x822   : > { %2095 = dma.done.wait (%p1814_p10), [#allocation6], 256  }
 0x823   : > { %2097 = vsyncadd (%p1814_p10), [#allocation6], 4294967040 }
 0x824 PF: > { %s2638_s28 = sld [smem:[#allocation18_spill]]  ;;  %s2641_s25 = smov %s2104_s26 }
 0x825   : > { %s2639_s29 = sld [smem:[#allocation17_spill]] }
 0x826   : > { %s2640_s27 = sld [smem:[#allocation19_spill]] }
 0x82a   : > { %p28_p4 = scmp.ge.s32.totalorder %s2638_s28, 4  }
 0x82b   : > { %s2642_s26 = smov %s2639_s29 }
 0x82c   :  { %30 = sbr.rel (!%p28_p4) target bundleno = 15 (0xf), region = 173 }
 0x831   :  { %1516 = vsyncpa [#allocation5], 1 }
 0x832   :  { %1518 = vsyncpa [#allocation5 + $0x1], 1 }
 0x833   :  { %1519 = vsyncpa [#allocation8], 1 }
 0x834   :  { %1521 = vsyncpa [#allocation8 + $0x1], 1 }
 0x835   :  { %1522 = vsyncpa [#allocation11], 1 }
 0x836   :  { %1524 = vsyncpa [#allocation11 + $0x1], 1 }
 0x837   :  { %1525 = vsyncpa [#allocation6], 1 }
 0x838   :  { %1527 = vsyncpa [#allocation6 + $0x1], 1 }

</bundles_post_ra>
